<compile_context>
chip_gen: v5e
topology: v5e:2x2
jax: 0.10.0
libtpu: 0.0.40
codegen_flags: <defaults>
</compile_context>

<pallas_src>
import functools

import jax
import jax.numpy as jnp
import numpy as np
from jax.experimental import pallas as pl
from jax.experimental.pallas import tpu as pltpu

LANE = 128
_DEFAULT_LANE_BLOCK = 1024                 # lanes (groups) per grid step
_VMEM_BIG_SLAB_BUDGET = 16 * 1024 * 1024   # budget for double-buffered big slabs
_VMEM_LIMIT_BYTES = 32 * 1024 * 1024       # scoped VMEM (safe on v5e/v6e/v7x 64MiB)


def _round_up(x, m):
    return -(-x // m) * m


def _jacobi_eig3(A, n_sweeps=3):
    """Cyclic Jacobi eigensolver for symmetric 3x3 matrices, vectorized over
    the (rb, 128) packed per-group layout.  A is a 3x3 nested list of
    identically-shaped f32 arrays.  Returns (eigenvalues, eigenvector
    columns) sorted ascending (torch.linalg.eigh / symeig3x3 convention):
    cols[j][k] = k-th component of the j-th eigenvector."""
    one = jnp.ones_like(A[0][0])
    zero = jnp.zeros_like(A[0][0])
    A = [[A[i][j] for j in range(3)] for i in range(3)]
    V = [[one if i == j else zero for j in range(3)] for i in range(3)]
    for _ in range(n_sweeps):
        for (p, q) in ((0, 1), (0, 2), (1, 2)):
            r = 3 - p - q
            apq = A[p][q]
            app, aqq = A[p][p], A[q][q]
            arp, arq = A[r][p], A[r][q]
            diff = aqq - app
            small = jnp.abs(apq) < jnp.float32(1e-37)
            # Overflow-free tangent of the Jacobi rotation angle; equivalent
            # to the classic sign(theta)/(|theta|+sqrt(theta^2+1)) with
            # theta=(aqq-app)/(2*apq), but needs a single EUP reciprocal and
            # never forms a huge intermediate.
            denom = jnp.abs(diff) + jnp.sqrt(diff * diff + 4.0 * apq * apq)
            denom = jnp.where(small, jnp.float32(1.0), denom)
            sgn = jnp.where(diff >= 0.0, jnp.float32(1.0), jnp.float32(-1.0))
            t = sgn * (2.0 * apq) * pl.reciprocal(denom, approx=True)
            t = jnp.where(small, jnp.float32(0.0), t)
            c = jax.lax.rsqrt(t * t + 1.0)
            s = t * c
            h = t * apq
            A[p][p] = app - h
            A[q][q] = aqq + h
            A[p][q] = zero
            A[q][p] = zero
            new_arp = c * arp - s * arq
            new_arq = s * arp + c * arq
            A[r][p] = new_arp
            A[p][r] = new_arp
            A[r][q] = new_arq
            A[q][r] = new_arq
            for j in range(3):
                vjp, vjq = V[j][p], V[j][q]
                V[j][p] = c * vjp - s * vjq
                V[j][q] = s * vjp + c * vjq
    evals = [A[0][0], A[1][1], A[2][2]]
    cols = [[V[0][j], V[1][j], V[2][j]] for j in range(3)]
    # sorting network -> ascending eigenvalues
    for (i, j) in ((0, 1), (0, 2), (1, 2)):
        swap = evals[i] > evals[j]
        ei, ej = evals[i], evals[j]
        evals[i] = jnp.where(swap, ej, ei)
        evals[j] = jnp.where(swap, ei, ej)
        ci, cj = cols[i], cols[j]
        cols[i] = [jnp.where(swap, cj[k], ci[k]) for k in range(3)]
        cols[j] = [jnp.where(swap, ci[k], cj[k]) for k in range(3)]
    return evals, cols


def lrf_kernel(*refs, s_true, has_ori):
    if has_ori:
        pos_ref, ori_ref, rotp_ref, roto_ref, lrf_ref, sc = refs
    else:
        pos_ref, rotp_ref, lrf_ref, sc = refs
        ori_ref = roto_ref = None

    s_pad = pos_ref.shape[1]
    blk_w = pos_ref.shape[2]
    rb = blk_w // LANE                      # 128-lane sub-blocks per grid step
    slot = _round_up(rb, 8)                 # 8-aligned scratch rows per scalar
    half_s = jnp.float32(0.5 * s_true)

    def lanes(r):
        return pl.ds(r * LANE, LANE)

    # ---- pass A: per 128-lane sub-block, weighted covariance -> scratch ----
    # Padded rows / lanes are ZERO-filled by the wrapper.  Zero points add
    # nothing to the covariance entries or the disambiguation votes, and only
    # rescale the (eigenvector-irrelevant) weight normalization, so no
    # explicit masking is needed anywhere in the kernel.
    for r in range(rb):
        px = pos_ref[0, :, lanes(r)]                      # (S_pad, 128)
        py = pos_ref[1, :, lanes(r)]
        pz = pos_ref[2, :, lanes(r)]
        norms = jnp.sqrt(px * px + py * py + pz * pz)
        max_norms = jnp.max(norms, axis=0, keepdims=True)
        wgt = max_norms - norms
        # per-group normalization; a uniform per-group scale error only
        # rescales the covariance, so the approx EUP reciprocal is exact for
        # the resulting LRFs.
        wgt = wgt * pl.reciprocal(
            jnp.sum(wgt, axis=0, keepdims=True) + 1e-6, approx=True)
        wx, wy, wz = wgt * px, wgt * py, wgt * pz
        cov6 = (jnp.sum(wx * px, axis=0, keepdims=True),
                jnp.sum(wx * py, axis=0, keepdims=True),
                jnp.sum(wx * pz, axis=0, keepdims=True),
                jnp.sum(wy * py, axis=0, keepdims=True),
                jnp.sum(wy * pz, axis=0, keepdims=True),
                jnp.sum(wz * pz, axis=0, keepdims=True))
        for e in range(6):
            sc[pl.ds(e * slot + r, 1), :] = cov6[e]

    # ---- packed stage: per-group scalar math at full sublane density -------
    # The VMEM scratch round-trip converts the (1, 128)-per-sub-block scalars
    # into dense (rb, 128) arrays, so the whole eigensolver runs at up to 8x
    # the previous vreg occupancy.
    c = [sc[pl.ds(e * slot, rb), :] for e in range(6)]    # each (rb, 128)
    cov = [[c[0], c[1], c[2]], [c[1], c[3], c[4]], [c[2], c[4], c[5]]]
    _, cols = _jacobi_eig3(cov, n_sweeps=3)

    def normalize(vec):
        inv = jax.lax.rsqrt(vec[0] * vec[0] + vec[1] * vec[1]
                            + vec[2] * vec[2] + jnp.float32(1e-12))
        return [v * inv for v in vec]

    z_axis = normalize(cols[0])       # eigenvector of smallest eigenvalue
    x_axis = normalize(cols[2])       # eigenvector of largest eigenvalue
    for i in range(3):
        sc[pl.ds((6 + i) * slot, rb), :] = z_axis[i]
        sc[pl.ds((9 + i) * slot, rb), :] = x_axis[i]

    # ---- pass B: per sub-block, disambiguate + cross + rotate + store ------
    for r in range(rb):
        px = pos_ref[0, :, lanes(r)]
        py = pos_ref[1, :, lanes(r)]
        pz = pos_ref[2, :, lanes(r)]

        def axis_rows(base):
            return [sc[pl.ds((base + i) * slot + r, 1), :] for i in range(3)]

        def disambiguate(vec):
            proj = vec[0] * px + vec[1] * py + vec[2] * pz     # (S_pad, 128)
            n_pos = jnp.sum((proj > 0.0).astype(jnp.float32),
                            axis=0, keepdims=True)
            scale = jnp.where(n_pos < half_s,
                              jnp.float32(-1.0), jnp.float32(1.0))
            return [scale * v for v in vec]

        z = disambiguate(axis_rows(6))
        x = disambiguate(axis_rows(9))
        y = [z[1] * x[2] - z[2] * x[1],
             z[2] * x[0] - z[0] * x[2],
             z[0] * x[1] - z[1] * x[0]]
        # lrf[k][j]: row k = coordinate, columns ordered (z, y, x); each (1,128)
        lrf = [[z[k], y[k], x[k]] for k in range(3)]

        for k in range(3):
            for j in range(3):
                lrf_ref[pl.ds(3 * k + j, 1), lanes(r)] = lrf[k][j]

        # rotate local point set (and orientations): out_j = sum_k p_k*lrf[k][j]
        for j in range(3):
            rotp_ref[j, :, lanes(r)] = (px * lrf[0][j] + py * lrf[1][j]
                                        + pz * lrf[2][j])
        if has_ori:
            ox = ori_ref[0, :, lanes(r)]
            oy = ori_ref[1, :, lanes(r)]
            oz = ori_ref[2, :, lanes(r)]
            for j in range(3):
                roto_ref[j, :, lanes(r)] = (ox * lrf[0][j] + oy * lrf[1][j]
                                            + oz * lrf[2][j])


def _lrf_forward_impl(neighbor, lane_block=_DEFAULT_LANE_BLOCK):
    B, G, S, C = neighbor.shape
    assert C in (3, 6)
    has_ori = (C == 6)
    neighbor = neighbor.astype(jnp.float32)
    pos = neighbor[..., 0:3]

    BG = B * G
    S_pad = _round_up(S, 8)
    bg128 = _round_up(BG, LANE)

    # VMEM-aware lane-block choice: the big (3, S_pad, W) slabs are
    # double-buffered by the pipeline; keep them under a fixed budget so the
    # kernel comfortably fits v7x's smaller (64 MiB) VMEM.
    n_big = 4 if has_ori else 2                      # pos in + rot out (+ ori pair)
    bytes_per_lane = 2 * n_big * 3 * S_pad * 4       # double-buffered f32 slabs
    w_cap = max(LANE, (_VMEM_BIG_SLAB_BUDGET // bytes_per_lane) // LANE * LANE)
    W = min(lane_block, bg128, w_cap)
    # v7x has 2 TensorCores: keep >= 2 grid steps whenever possible so
    # dimension_semantics=("parallel",) can shard the group axis across them.
    if bg128 >= 2 * LANE:
        W = min(W, _round_up(-(-bg128 // 2), LANE))
    W = max(W, LANE)
    BG_pad = _round_up(bg128, W)
    grid = (BG_pad // W,)
    slot = _round_up(W // LANE, 8)                   # scratch rows per scalar

    # NOTE: the kernel relies on the S_pad-S rows and BG_pad-BG lanes being
    # ZERO (jnp.pad default) -- do not change this padding.
    def to_kernel_layout(a):                         # (B,G,S,3) -> (3,S_pad,BG_pad)
        a = a.reshape(BG, S, 3).transpose(2, 1, 0)
        return jnp.pad(a, ((0, 0), (0, S_pad - S), (0, BG_pad - BG)))

    big_spec = pl.BlockSpec((3, S_pad, W), lambda g: (0, 0, g))
    inputs = [to_kernel_layout(pos)]
    in_specs = [big_spec]
    out_shape = [jax.ShapeDtypeStruct((3, S_pad, BG_pad), jnp.float32)]
    out_specs = [big_spec]
    if has_ori:
        inputs.append(to_kernel_layout(neighbor[..., 3:6]))
        in_specs.append(big_spec)
        out_shape.append(jax.ShapeDtypeStruct((3, S_pad, BG_pad), jnp.float32))
        out_specs.append(big_spec)
    out_shape.append(jax.ShapeDtypeStruct((9, BG_pad), jnp.float32))
    out_specs.append(pl.BlockSpec((9, W), lambda g: (0, g)))

    kernel = functools.partial(lrf_kernel, s_true=S, has_ori=has_ori)
    outs = pl.pallas_call(
        kernel,
        out_shape=tuple(out_shape),
        grid_spec=pltpu.PrefetchScalarGridSpec(
            num_scalar_prefetch=0,
            grid=grid,
            in_specs=in_specs,
            out_specs=tuple(out_specs),
            scratch_shapes=[pltpu.VMEM((12 * slot, LANE), jnp.float32)]),
        compiler_params=pltpu.CompilerParams(
            dimension_semantics=("parallel",),
            vmem_limit_bytes=_VMEM_LIMIT_BYTES),
    )(*inputs)

    def from_kernel_layout(a):                       # (3,S_pad,BG_pad) -> (B,G,S,3)
        return a[:, :S, :BG].transpose(2, 1, 0).reshape(B, G, S, 3)

    rot_pos = from_kernel_layout(outs[0])
    lrf_flat = outs[-1]
    lrfs = lrf_flat[:, :BG].T.reshape(B, G, 3, 3)
    if has_ori:
        rot_neighbor = jnp.concatenate([rot_pos, from_kernel_layout(outs[1])],
                                       axis=3)
    else:
        rot_neighbor = rot_pos
    return rot_neighbor, lrfs


@jax.jit
def lrf_forward(neighbor, center=None):
    """Pallas/TPU equivalent of LRF.forward (axis1='pca', axis2='pca').
    neighbor: (B, G, S, 3 or 6); center is unused (as in the torch code)."""
    del center
    return _lrf_forward_impl(neighbor)


def _reference_forward(neighbor):
    """Pure-JAX reference mirroring the torch code (uses jnp.linalg.eigh)."""
    B, G, S, C = neighbor.shape
    pos = neighbor[..., 0:3]
    norms = jnp.linalg.norm(pos, axis=3, keepdims=True)
    max_norms = jnp.max(norms, axis=2, keepdims=True)
    w = max_norms - norms
    w = w / (jnp.sum(w, axis=2, keepdims=True) + 1e-6)
    sp = 100.0 * pos
    covs = jnp.einsum('bijk,bijl->bikl', w * sp, sp)
    _, eigvec = jnp.linalg.eigh(covs)

    def disamb(lps, vecs):
        knn = lps.shape[2]
        proj = (vecs[:, :, None] * lps).sum(3)
        n_pos = (proj > 0).astype(jnp.float32).sum(2, keepdims=True)
        flip = (n_pos < 0.5 * knn).astype(jnp.float32)
        return (1.0 - 2.0 * flip) * vecs

    z = disamb(pos, eigvec[:, :, :, 0])
    x = disamb(pos, eigvec[:, :, :, 2])
    y = jnp.cross(z, x)
    lrfs = jnp.stack((z, y, x), axis=3)
    rot = jnp.einsum('bgsk,bgkj->bgsj', pos, lrfs)
    if C == 6:
        rot_o = jnp.einsum('bgsk,bgkj->bgsj', neighbor[..., 3:6], lrfs)
        rot = jnp.concatenate([rot, rot_o], axis=3)
    return rot, lrfs


def _check_case(neighbor, rot_kern, lrfs_kern):
    neighbor = np.asarray(neighbor, dtype=np.float32)
    rot_kern = np.asarray(rot_kern)
    lrfs_kern = np.asarray(lrfs_kern)
    B, G, S, C = neighbor.shape
    pos = neighbor[..., :3]

    # (a) LRFs are orthonormal
    gram = np.einsum('bgki,bgkj->bgij', lrfs_kern, lrfs_kern)
    np.testing.assert_allclose(
        gram, np.broadcast_to(np.eye(3, dtype=np.float32), gram.shape),
        atol=2e-3)

    # (b) rotated outputs are consistent with the kernel's own frames
    np.testing.assert_allclose(
        rot_kern[..., :3], np.einsum('bgsk,bgkj->bgsj', pos, lrfs_kern),
        atol=1e-3)
    if C == 6:
        np.testing.assert_allclose(
            rot_kern[..., 3:6],
            np.einsum('bgsk,bgkj->bgsj', neighbor[..., 3:6], lrfs_kern),
            atol=1e-3)

    # (c) match the eigh-based reference.  The "majority of positive
    # projections" sign disambiguation is discontinuous: when the vote is
    # within +-1 of the S/2 threshold, two float implementations can
    # legitimately flip opposite ways, so compare up to that sign ambiguity.
    rot_ref, lrfs_ref = _reference_forward(jnp.asarray(neighbor))
    rot_ref, lrfs_ref = np.asarray(rot_ref), np.asarray(lrfs_ref)
    dz = np.sum(lrfs_kern[..., 0] * lrfs_ref[..., 0], axis=-1)
    dx = np.sum(lrfs_kern[..., 2] * lrfs_ref[..., 2], axis=-1)
    np.testing.assert_allclose(np.abs(dz), 1.0, atol=5e-3)   # same axes up to sign
    np.testing.assert_allclose(np.abs(dx), 1.0, atol=5e-3)
    sz, sx = np.sign(dz), np.sign(dx)
    col_sign = np.stack([sz, sz * sx, sx], axis=-1)           # y = z x x
    np.testing.assert_allclose(lrfs_kern, lrfs_ref * col_sign[..., None, :],
                               atol=1e-2)
    sign_rot = col_sign[:, :, None, :]
    if C == 6:
        sign_rot = np.concatenate([sign_rot, sign_rot], axis=-1)
    np.testing.assert_allclose(rot_kern, rot_ref * sign_rot, atol=1e-2)

    # (d) wherever the disambiguation vote is unambiguous, signs must match
    def margin(vecs):
        proj = np.einsum('bgk,bgsk->bgs', vecs, pos)
        n_pos = (proj > 0).astype(np.float32).sum(-1)
        return np.abs(n_pos - 0.5 * S)
    assert np.all((margin(lrfs_ref[..., 0]) < 2.0) | (sz > 0))
    assert np.all((margin(lrfs_ref[..., 2]) < 2.0) | (sx > 0))


if __name__ == "__main__":
    key = jax.random.PRNGKey(0)
    k1, k2, k3 = jax.random.split(key, 3)

    # Case 1: C == 3, S a multiple of 8 (no orientation traffic).
    B, G, S = 2, 8, 32
    scale3 = jnp.array([2.0, 1.0, 0.4], dtype=jnp.float32)   # well-separated spectrum
    neighbor3 = jax.random.normal(k1, (B, G, S, 3), dtype=jnp.float32) * scale3
    center3 = jax.random.normal(k2, (B, G, 3), dtype=jnp.float32)
    rot3, lrfs3 = jax.block_until_ready(lrf_forward(neighbor3, center3))
    assert rot3.shape == (B, G, S, 3) and lrfs3.shape == (B, G, 3, 3)
    _check_case(neighbor3, rot3, lrfs3)

    # Case 2: C == 6, S not a multiple of 8 (zero-padded rows + orientation path).
    B2, G2, S2 = 2, 4, 20
    scale6 = jnp.array([2.0, 1.0, 0.4, 1.0, 1.0, 1.0], dtype=jnp.float32)
    neighbor6 = jax.random.normal(k3, (B2, G2, S2, 6), dtype=jnp.float32) * scale6
    rot6, lrfs6 = jax.block_until_ready(lrf_forward(neighbor6))
    assert rot6.shape == (B2, G2, S2, 6) and lrfs6.shape == (B2, G2, 3, 3)
    _check_case(neighbor6, rot6, lrfs6)

    print("KERNEL_OK")
</pallas_src>

<mosaic_0001>
module attributes {stable_mosaic.version = 11 : i64} {
  func.func @lrf_kernel(%arg0: i32, %arg1: memref<3x32x128xf32, #tpu.memory_space<vmem>>, %arg2: memref<3x32x128xf32, #tpu.memory_space<vmem>>, %arg3: memref<9x128xf32, #tpu.memory_space<vmem>>, %arg4: memref<96x128xf32, #tpu.memory_space<vmem>>) attributes {dimension_semantics = [#tpu.dimension_semantics<parallel>], iteration_bounds = array<i64: 1>, scalar_prefetch = 0 : i64, scratch_operands = 1 : i64, tpu.core_type = #tpu.core_type<tc>, window_params = [{transform_indices = @transform_0, window_bounds = array<i64: 3, 32, 128>}, {transform_indices = @transform_1, window_bounds = array<i64: 3, 32, 128>}, {transform_indices = @transform_2, window_bounds = array<i64: 9, 128>}]} {
    %c0 = arith.constant 0 : index
    %c0_0 = arith.constant 0 : index
    %c0_1 = arith.constant 0 : index
    %0 = vector.load %arg1[%c0, %c0_0, %c0_1] : memref<3x32x128xf32, #tpu.memory_space<vmem>>, vector<1x32x128xf32>
    %1 = vector.shape_cast %0 : vector<1x32x128xf32> to vector<32x128xf32>
    %c1 = arith.constant 1 : index
    %c0_2 = arith.constant 0 : index
    %c0_3 = arith.constant 0 : index
    %2 = vector.load %arg1[%c1, %c0_2, %c0_3] : memref<3x32x128xf32, #tpu.memory_space<vmem>>, vector<1x32x128xf32>
    %3 = vector.shape_cast %2 : vector<1x32x128xf32> to vector<32x128xf32>
    %c2 = arith.constant 2 : index
    %c0_4 = arith.constant 0 : index
    %c0_5 = arith.constant 0 : index
    %4 = vector.load %arg1[%c2, %c0_4, %c0_5] : memref<3x32x128xf32, #tpu.memory_space<vmem>>, vector<1x32x128xf32>
    %5 = vector.shape_cast %4 : vector<1x32x128xf32> to vector<32x128xf32>
    %6 = arith.mulf %1, %1 : vector<32x128xf32>
    %7 = arith.mulf %3, %3 : vector<32x128xf32>
    %8 = arith.addf %6, %7 : vector<32x128xf32>
    %9 = arith.mulf %5, %5 : vector<32x128xf32>
    %10 = arith.addf %8, %9 : vector<32x128xf32>
    %11 = math.sqrt %10 : vector<32x128xf32>
    %cst = arith.constant dense<0xFF800000> : vector<128xf32>
    %12 = vector.multi_reduction <maximumf>, %11, %cst [0] : vector<32x128xf32> to vector<128xf32>
    %13 = vector.shape_cast %12 : vector<128xf32> to vector<1x128xf32>
    %14 = vector.broadcast %13 : vector<1x128xf32> to vector<32x128xf32>
    %15 = arith.subf %14, %11 : vector<32x128xf32>
    %cst_6 = arith.constant dense<0.000000e+00> : vector<128xf32>
    %16 = vector.multi_reduction <add>, %15, %cst_6 [0] : vector<32x128xf32> to vector<128xf32>
    %17 = vector.shape_cast %16 : vector<128xf32> to vector<1x128xf32>
    %cst_7 = arith.constant 9.99999997E-7 : f32
    %18 = vector.broadcast %cst_7 : f32 to vector<1x128xf32>
    %19 = arith.addf %17, %18 : vector<1x128xf32>
    %20 = tpu.reciprocal %19 {approx = true} : vector<1x128xf32> -> vector<1x128xf32>
    %21 = vector.broadcast %20 : vector<1x128xf32> to vector<32x128xf32>
    %22 = arith.mulf %15, %21 : vector<32x128xf32>
    %23 = arith.mulf %22, %1 : vector<32x128xf32>
    %24 = arith.mulf %22, %3 : vector<32x128xf32>
    %25 = arith.mulf %22, %5 : vector<32x128xf32>
    %26 = arith.mulf %23, %1 : vector<32x128xf32>
    %cst_8 = arith.constant dense<0.000000e+00> : vector<128xf32>
    %27 = vector.multi_reduction <add>, %26, %cst_8 [0] : vector<32x128xf32> to vector<128xf32>
    %28 = vector.shape_cast %27 : vector<128xf32> to vector<1x128xf32>
    %29 = arith.mulf %23, %3 : vector<32x128xf32>
    %cst_9 = arith.constant dense<0.000000e+00> : vector<128xf32>
    %30 = vector.multi_reduction <add>, %29, %cst_9 [0] : vector<32x128xf32> to vector<128xf32>
    %31 = vector.shape_cast %30 : vector<128xf32> to vector<1x128xf32>
    %32 = arith.mulf %23, %5 : vector<32x128xf32>
    %cst_10 = arith.constant dense<0.000000e+00> : vector<128xf32>
    %33 = vector.multi_reduction <add>, %32, %cst_10 [0] : vector<32x128xf32> to vector<128xf32>
    %34 = vector.shape_cast %33 : vector<128xf32> to vector<1x128xf32>
    %35 = arith.mulf %24, %3 : vector<32x128xf32>
    %cst_11 = arith.constant dense<0.000000e+00> : vector<128xf32>
    %36 = vector.multi_reduction <add>, %35, %cst_11 [0] : vector<32x128xf32> to vector<128xf32>
    %37 = vector.shape_cast %36 : vector<128xf32> to vector<1x128xf32>
    %38 = arith.mulf %24, %5 : vector<32x128xf32>
    %cst_12 = arith.constant dense<0.000000e+00> : vector<128xf32>
    %39 = vector.multi_reduction <add>, %38, %cst_12 [0] : vector<32x128xf32> to vector<128xf32>
    %40 = vector.shape_cast %39 : vector<128xf32> to vector<1x128xf32>
    %41 = arith.mulf %25, %5 : vector<32x128xf32>
    %cst_13 = arith.constant dense<0.000000e+00> : vector<128xf32>
    %42 = vector.multi_reduction <add>, %41, %cst_13 [0] : vector<32x128xf32> to vector<128xf32>
    %43 = vector.shape_cast %42 : vector<128xf32> to vector<1x128xf32>
    %c0_14 = arith.constant 0 : index
    %c0_15 = arith.constant 0 : index
    %44 = vector.load %arg4[%c0_14, %c0_15] : memref<96x128xf32, #tpu.memory_space<vmem>>, vector<1x128xf32>
    tpu.vector_store %arg4[%c0_14, %c0_15], %28 {strides = array<i32>} : memref<96x128xf32, #tpu.memory_space<vmem>>, vector<1x128xf32>,
    %c8 = arith.constant 8 : index
    %c0_16 = arith.constant 0 : index
    %45 = vector.load %arg4[%c8, %c0_16] : memref<96x128xf32, #tpu.memory_space<vmem>>, vector<1x128xf32>
    tpu.vector_store %arg4[%c8, %c0_16], %31 {strides = array<i32>} : memref<96x128xf32, #tpu.memory_space<vmem>>, vector<1x128xf32>,
    %c16 = arith.constant 16 : index
    %c0_17 = arith.constant 0 : index
    %46 = vector.load %arg4[%c16, %c0_17] : memref<96x128xf32, #tpu.memory_space<vmem>>, vector<1x128xf32>
    tpu.vector_store %arg4[%c16, %c0_17], %34 {strides = array<i32>} : memref<96x128xf32, #tpu.memory_space<vmem>>, vector<1x128xf32>,
    %c24 = arith.constant 24 : index
    %c0_18 = arith.constant 0 : index
    %47 = vector.load %arg4[%c24, %c0_18] : memref<96x128xf32, #tpu.memory_space<vmem>>, vector<1x128xf32>
    tpu.vector_store %arg4[%c24, %c0_18], %37 {strides = array<i32>} : memref<96x128xf32, #tpu.memory_space<vmem>>, vector<1x128xf32>,
    %c32 = arith.constant 32 : index
    %c0_19 = arith.constant 0 : index
    %48 = vector.load %arg4[%c32, %c0_19] : memref<96x128xf32, #tpu.memory_space<vmem>>, vector<1x128xf32>
    tpu.vector_store %arg4[%c32, %c0_19], %40 {strides = array<i32>} : memref<96x128xf32, #tpu.memory_space<vmem>>, vector<1x128xf32>,
    %c40 = arith.constant 40 : index
    %c0_20 = arith.constant 0 : index
    %49 = vector.load %arg4[%c40, %c0_20] : memref<96x128xf32, #tpu.memory_space<vmem>>, vector<1x128xf32>
    tpu.vector_store %arg4[%c40, %c0_20], %43 {strides = array<i32>} : memref<96x128xf32, #tpu.memory_space<vmem>>, vector<1x128xf32>,
    %c0_21 = arith.constant 0 : index
    %c0_22 = arith.constant 0 : index
    %50 = vector.load %arg4[%c0_21, %c0_22] : memref<96x128xf32, #tpu.memory_space<vmem>>, vector<1x128xf32>
    %c8_23 = arith.constant 8 : index
    %c0_24 = arith.constant 0 : index
    %51 = vector.load %arg4[%c8_23, %c0_24] : memref<96x128xf32, #tpu.memory_space<vmem>>, vector<1x128xf32>
    %c16_25 = arith.constant 16 : index
    %c0_26 = arith.constant 0 : index
    %52 = vector.load %arg4[%c16_25, %c0_26] : memref<96x128xf32, #tpu.memory_space<vmem>>, vector<1x128xf32>
    %c24_27 = arith.constant 24 : index
    %c0_28 = arith.constant 0 : index
    %53 = vector.load %arg4[%c24_27, %c0_28] : memref<96x128xf32, #tpu.memory_space<vmem>>, vector<1x128xf32>
    %c32_29 = arith.constant 32 : index
    %c0_30 = arith.constant 0 : index
    %54 = vector.load %arg4[%c32_29, %c0_30] : memref<96x128xf32, #tpu.memory_space<vmem>>, vector<1x128xf32>
    %c40_31 = arith.constant 40 : index
    %c0_32 = arith.constant 0 : index
    %55 = vector.load %arg4[%c40_31, %c0_32] : memref<96x128xf32, #tpu.memory_space<vmem>>, vector<1x128xf32>
    %cst_33 = arith.constant 1.000000e+00 : f32
    %56 = vector.broadcast %cst_33 : f32 to vector<1x128xf32>
    %cst_34 = arith.constant 0.000000e+00 : f32
    %57 = vector.broadcast %cst_34 : f32 to vector<1x128xf32>
    %58 = arith.subf %53, %50 : vector<1x128xf32>
    %59 = math.absf %51 : vector<1x128xf32>
    %cst_35 = arith.constant 9.99999991E-38 : f32
    %60 = vector.broadcast %cst_35 : f32 to vector<1x128xf32>
    %61 = arith.cmpf olt, %59, %60 : vector<1x128xf32>
    %62 = math.absf %58 : vector<1x128xf32>
    %63 = arith.mulf %58, %58 : vector<1x128xf32>
    %cst_36 = arith.constant 4.000000e+00 : f32
    %64 = vector.broadcast %cst_36 : f32 to vector<1x128xf32>
    %65 = arith.mulf %64, %51 : vector<1x128xf32>
    %66 = arith.mulf %65, %51 : vector<1x128xf32>
    %67 = arith.addf %63, %66 : vector<1x128xf32>
    %68 = math.sqrt %67 : vector<1x128xf32>
    %69 = arith.addf %62, %68 : vector<1x128xf32>
    %cst_37 = arith.constant 1.000000e+00 : f32
    %70 = vector.broadcast %cst_37 : f32 to vector<1x128xf32>
    %71 = arith.select %61, %70, %69 : vector<1x128xi1>, vector<1x128xf32>
    %cst_38 = arith.constant 0.000000e+00 : f32
    %72 = vector.broadcast %cst_38 : f32 to vector<1x128xf32>
    %73 = arith.cmpf oge, %58, %72 : vector<1x128xf32>
    %cst_39 = arith.constant 1.000000e+00 : f32
    %cst_40 = arith.constant -1.000000e+00 : f32
    %74 = vector.broadcast %cst_39 : f32 to vector<1x128xf32>
    %75 = vector.broadcast %cst_40 : f32 to vector<1x128xf32>
    %76 = arith.select %73, %74, %75 : vector<1x128xi1>, vector<1x128xf32>
    %cst_41 = arith.constant 2.000000e+00 : f32
    %77 = vector.broadcast %cst_41 : f32 to vector<1x128xf32>
    %78 = arith.mulf %77, %51 : vector<1x128xf32>
    %79 = arith.mulf %76, %78 : vector<1x128xf32>
    %80 = tpu.reciprocal %71 {approx = true} : vector<1x128xf32> -> vector<1x128xf32>
    %81 = arith.mulf %79, %80 : vector<1x128xf32>
    %cst_42 = arith.constant 0.000000e+00 : f32
    %82 = vector.broadcast %cst_42 : f32 to vector<1x128xf32>
    %83 = arith.select %61, %82, %81 : vector<1x128xi1>, vector<1x128xf32>
    %84 = arith.mulf %83, %83 : vector<1x128xf32>
    %cst_43 = arith.constant 1.000000e+00 : f32
    %85 = vector.broadcast %cst_43 : f32 to vector<1x128xf32>
    %86 = arith.addf %84, %85 : vector<1x128xf32>
    %87 = math.rsqrt %86 : vector<1x128xf32>
    %88 = arith.mulf %83, %87 : vector<1x128xf32>
    %89 = arith.mulf %83, %51 : vector<1x128xf32>
    %90 = arith.subf %50, %89 : vector<1x128xf32>
    %91 = arith.addf %53, %89 : vector<1x128xf32>
    %92 = arith.mulf %87, %52 : vector<1x128xf32>
    %93 = arith.mulf %88, %54 : vector<1x128xf32>
    %94 = arith.subf %92, %93 : vector<1x128xf32>
    %95 = arith.mulf %88, %52 : vector<1x128xf32>
    %96 = arith.mulf %87, %54 : vector<1x128xf32>
    %97 = arith.addf %95, %96 : vector<1x128xf32>
    %98 = arith.mulf %87, %56 : vector<1x128xf32>
    %99 = arith.mulf %88, %57 : vector<1x128xf32>
    %100 = arith.subf %98, %99 : vector<1x128xf32>
    %101 = arith.mulf %88, %56 : vector<1x128xf32>
    %102 = arith.mulf %87, %57 : vector<1x128xf32>
    %103 = arith.addf %101, %102 : vector<1x128xf32>
    %104 = arith.mulf %87, %57 : vector<1x128xf32>
    %105 = arith.mulf %88, %56 : vector<1x128xf32>
    %106 = arith.subf %104, %105 : vector<1x128xf32>
    %107 = arith.mulf %88, %57 : vector<1x128xf32>
    %108 = arith.mulf %87, %56 : vector<1x128xf32>
    %109 = arith.addf %107, %108 : vector<1x128xf32>
    %110 = arith.mulf %87, %57 : vector<1x128xf32>
    %111 = arith.mulf %88, %57 : vector<1x128xf32>
    %112 = arith.subf %110, %111 : vector<1x128xf32>
    %113 = arith.mulf %88, %57 : vector<1x128xf32>
    %114 = arith.mulf %87, %57 : vector<1x128xf32>
    %115 = arith.addf %113, %114 : vector<1x128xf32>
    %116 = arith.subf %55, %90 : vector<1x128xf32>
    %117 = math.absf %94 : vector<1x128xf32>
    %cst_44 = arith.constant 9.99999991E-38 : f32
    %118 = vector.broadcast %cst_44 : f32 to vector<1x128xf32>
    %119 = arith.cmpf olt, %117, %118 : vector<1x128xf32>
    %120 = math.absf %116 : vector<1x128xf32>
    %121 = arith.mulf %116, %116 : vector<1x128xf32>
    %cst_45 = arith.constant 4.000000e+00 : f32
    %122 = vector.broadcast %cst_45 : f32 to vector<1x128xf32>
    %123 = arith.mulf %122, %94 : vector<1x128xf32>
    %124 = arith.mulf %123, %94 : vector<1x128xf32>
    %125 = arith.addf %121, %124 : vector<1x128xf32>
    %126 = math.sqrt %125 : vector<1x128xf32>
    %127 = arith.addf %120, %126 : vector<1x128xf32>
    %cst_46 = arith.constant 1.000000e+00 : f32
    %128 = vector.broadcast %cst_46 : f32 to vector<1x128xf32>
    %129 = arith.select %119, %128, %127 : vector<1x128xi1>, vector<1x128xf32>
    %cst_47 = arith.constant 0.000000e+00 : f32
    %130 = vector.broadcast %cst_47 : f32 to vector<1x128xf32>
    %131 = arith.cmpf oge, %116, %130 : vector<1x128xf32>
    %cst_48 = arith.constant 1.000000e+00 : f32
    %cst_49 = arith.constant -1.000000e+00 : f32
    %132 = vector.broadcast %cst_48 : f32 to vector<1x128xf32>
    %133 = vector.broadcast %cst_49 : f32 to vector<1x128xf32>
    %134 = arith.select %131, %132, %133 : vector<1x128xi1>, vector<1x128xf32>
    %cst_50 = arith.constant 2.000000e+00 : f32
    %135 = vector.broadcast %cst_50 : f32 to vector<1x128xf32>
    %136 = arith.mulf %135, %94 : vector<1x128xf32>
    %137 = arith.mulf %134, %136 : vector<1x128xf32>
    %138 = tpu.reciprocal %129 {approx = true} : vector<1x128xf32> -> vector<1x128xf32>
    %139 = arith.mulf %137, %138 : vector<1x128xf32>
    %cst_51 = arith.constant 0.000000e+00 : f32
    %140 = vector.broadcast %cst_51 : f32 to vector<1x128xf32>
    %141 = arith.select %119, %140, %139 : vector<1x128xi1>, vector<1x128xf32>
    %142 = arith.mulf %141, %141 : vector<1x128xf32>
    %cst_52 = arith.constant 1.000000e+00 : f32
    %143 = vector.broadcast %cst_52 : f32 to vector<1x128xf32>
    %144 = arith.addf %142, %143 : vector<1x128xf32>
    %145 = math.rsqrt %144 : vector<1x128xf32>
    %146 = arith.mulf %141, %145 : vector<1x128xf32>
    %147 = arith.mulf %141, %94 : vector<1x128xf32>
    %148 = arith.subf %90, %147 : vector<1x128xf32>
    %149 = arith.addf %55, %147 : vector<1x128xf32>
    %150 = arith.mulf %145, %57 : vector<1x128xf32>
    %151 = arith.mulf %146, %97 : vector<1x128xf32>
    %152 = arith.subf %150, %151 : vector<1x128xf32>
    %153 = arith.mulf %146, %57 : vector<1x128xf32>
    %154 = arith.mulf %145, %97 : vector<1x128xf32>
    %155 = arith.addf %153, %154 : vector<1x128xf32>
    %156 = arith.mulf %145, %100 : vector<1x128xf32>
    %157 = arith.mulf %146, %57 : vector<1x128xf32>
    %158 = arith.subf %156, %157 : vector<1x128xf32>
    %159 = arith.mulf %146, %100 : vector<1x128xf32>
    %160 = arith.mulf %145, %57 : vector<1x128xf32>
    %161 = arith.addf %159, %160 : vector<1x128xf32>
    %162 = arith.mulf %145, %106 : vector<1x128xf32>
    %163 = arith.mulf %146, %57 : vector<1x128xf32>
    %164 = arith.subf %162, %163 : vector<1x128xf32>
    %165 = arith.mulf %146, %106 : vector<1x128xf32>
    %166 = arith.mulf %145, %57 : vector<1x128xf32>
    %167 = arith.addf %165, %166 : vector<1x128xf32>
    %168 = arith.mulf %145, %112 : vector<1x128xf32>
    %169 = arith.mulf %146, %56 : vector<1x128xf32>
    %170 = arith.subf %168, %169 : vector<1x128xf32>
    %171 = arith.mulf %146, %112 : vector<1x128xf32>
    %172 = arith.mulf %145, %56 : vector<1x128xf32>
    %173 = arith.addf %171, %172 : vector<1x128xf32>
    %174 = arith.subf %149, %91 : vector<1x128xf32>
    %175 = math.absf %155 : vector<1x128xf32>
    %cst_53 = arith.constant 9.99999991E-38 : f32
    %176 = vector.broadcast %cst_53 : f32 to vector<1x128xf32>
    %177 = arith.cmpf olt, %175, %176 : vector<1x128xf32>
    %178 = math.absf %174 : vector<1x128xf32>
    %179 = arith.mulf %174, %174 : vector<1x128xf32>
    %cst_54 = arith.constant 4.000000e+00 : f32
    %180 = vector.broadcast %cst_54 : f32 to vector<1x128xf32>
    %181 = arith.mulf %180, %155 : vector<1x128xf32>
    %182 = arith.mulf %181, %155 : vector<1x128xf32>
    %183 = arith.addf %179, %182 : vector<1x128xf32>
    %184 = math.sqrt %183 : vector<1x128xf32>
    %185 = arith.addf %178, %184 : vector<1x128xf32>
    %cst_55 = arith.constant 1.000000e+00 : f32
    %186 = vector.broadcast %cst_55 : f32 to vector<1x128xf32>
    %187 = arith.select %177, %186, %185 : vector<1x128xi1>, vector<1x128xf32>
    %cst_56 = arith.constant 0.000000e+00 : f32
    %188 = vector.broadcast %cst_56 : f32 to vector<1x128xf32>
    %189 = arith.cmpf oge, %174, %188 : vector<1x128xf32>
    %cst_57 = arith.constant 1.000000e+00 : f32
    %cst_58 = arith.constant -1.000000e+00 : f32
    %190 = vector.broadcast %cst_57 : f32 to vector<1x128xf32>
    %191 = vector.broadcast %cst_58 : f32 to vector<1x128xf32>
    %192 = arith.select %189, %190, %191 : vector<1x128xi1>, vector<1x128xf32>
    %cst_59 = arith.constant 2.000000e+00 : f32
    %193 = vector.broadcast %cst_59 : f32 to vector<1x128xf32>
    %194 = arith.mulf %193, %155 : vector<1x128xf32>
    %195 = arith.mulf %192, %194 : vector<1x128xf32>
    %196 = tpu.reciprocal %187 {approx = true} : vector<1x128xf32> -> vector<1x128xf32>
    %197 = arith.mulf %195, %196 : vector<1x128xf32>
    %cst_60 = arith.constant 0.000000e+00 : f32
    %198 = vector.broadcast %cst_60 : f32 to vector<1x128xf32>
    %199 = arith.select %177, %198, %197 : vector<1x128xi1>, vector<1x128xf32>
    %200 = arith.mulf %199, %199 : vector<1x128xf32>
    %cst_61 = arith.constant 1.000000e+00 : f32
    %201 = vector.broadcast %cst_61 : f32 to vector<1x128xf32>
    %202 = arith.addf %200, %201 : vector<1x128xf32>
    %203 = math.rsqrt %202 : vector<1x128xf32>
    %204 = arith.mulf %199, %203 : vector<1x128xf32>
    %205 = arith.mulf %199, %155 : vector<1x128xf32>
    %206 = arith.subf %91, %205 : vector<1x128xf32>
    %207 = arith.addf %149, %205 : vector<1x128xf32>
    %208 = arith.mulf %203, %152 : vector<1x128xf32>
    %209 = arith.mulf %204, %57 : vector<1x128xf32>
    %210 = arith.subf %208, %209 : vector<1x128xf32>
    %211 = arith.mulf %204, %152 : vector<1x128xf32>
    %212 = arith.mulf %203, %57 : vector<1x128xf32>
    %213 = arith.addf %211, %212 : vector<1x128xf32>
    %214 = arith.mulf %203, %103 : vector<1x128xf32>
    %215 = arith.mulf %204, %161 : vector<1x128xf32>
    %216 = arith.subf %214, %215 : vector<1x128xf32>
    %217 = arith.mulf %204, %103 : vector<1x128xf32>
    %218 = arith.mulf %203, %161 : vector<1x128xf32>
    %219 = arith.addf %217, %218 : vector<1x128xf32>
    %220 = arith.mulf %203, %109 : vector<1x128xf32>
    %221 = arith.mulf %204, %167 : vector<1x128xf32>
    %222 = arith.subf %220, %221 : vector<1x128xf32>
    %223 = arith.mulf %204, %109 : vector<1x128xf32>
    %224 = arith.mulf %203, %167 : vector<1x128xf32>
    %225 = arith.addf %223, %224 : vector<1x128xf32>
    %226 = arith.mulf %203, %115 : vector<1x128xf32>
    %227 = arith.mulf %204, %173 : vector<1x128xf32>
    %228 = arith.subf %226, %227 : vector<1x128xf32>
    %229 = arith.mulf %204, %115 : vector<1x128xf32>
    %230 = arith.mulf %203, %173 : vector<1x128xf32>
    %231 = arith.addf %229, %230 : vector<1x128xf32>
    %232 = arith.subf %206, %148 : vector<1x128xf32>
    %233 = math.absf %210 : vector<1x128xf32>
    %cst_62 = arith.constant 9.99999991E-38 : f32
    %234 = vector.broadcast %cst_62 : f32 to vector<1x128xf32>
    %235 = arith.cmpf olt, %233, %234 : vector<1x128xf32>
    %236 = math.absf %232 : vector<1x128xf32>
    %237 = arith.mulf %232, %232 : vector<1x128xf32>
    %cst_63 = arith.constant 4.000000e+00 : f32
    %238 = vector.broadcast %cst_63 : f32 to vector<1x128xf32>
    %239 = arith.mulf %238, %210 : vector<1x128xf32>
    %240 = arith.mulf %239, %210 : vector<1x128xf32>
    %241 = arith.addf %237, %240 : vector<1x128xf32>
    %242 = math.sqrt %241 : vector<1x128xf32>
    %243 = arith.addf %236, %242 : vector<1x128xf32>
    %cst_64 = arith.constant 1.000000e+00 : f32
    %244 = vector.broadcast %cst_64 : f32 to vector<1x128xf32>
    %245 = arith.select %235, %244, %243 : vector<1x128xi1>, vector<1x128xf32>
    %cst_65 = arith.constant 0.000000e+00 : f32
    %246 = vector.broadcast %cst_65 : f32 to vector<1x128xf32>
    %247 = arith.cmpf oge, %232, %246 : vector<1x128xf32>
    %cst_66 = arith.constant 1.000000e+00 : f32
    %cst_67 = arith.constant -1.000000e+00 : f32
    %248 = vector.broadcast %cst_66 : f32 to vector<1x128xf32>
    %249 = vector.broadcast %cst_67 : f32 to vector<1x128xf32>
    %250 = arith.select %247, %248, %249 : vector<1x128xi1>, vector<1x128xf32>
    %cst_68 = arith.constant 2.000000e+00 : f32
    %251 = vector.broadcast %cst_68 : f32 to vector<1x128xf32>
    %252 = arith.mulf %251, %210 : vector<1x128xf32>
    %253 = arith.mulf %250, %252 : vector<1x128xf32>
    %254 = tpu.reciprocal %245 {approx = true} : vector<1x128xf32> -> vector<1x128xf32>
    %255 = arith.mulf %253, %254 : vector<1x128xf32>
    %cst_69 = arith.constant 0.000000e+00 : f32
    %256 = vector.broadcast %cst_69 : f32 to vector<1x128xf32>
    %257 = arith.select %235, %256, %255 : vector<1x128xi1>, vector<1x128xf32>
    %258 = arith.mulf %257, %257 : vector<1x128xf32>
    %cst_70 = arith.constant 1.000000e+00 : f32
    %259 = vector.broadcast %cst_70 : f32 to vector<1x128xf32>
    %260 = arith.addf %258, %259 : vector<1x128xf32>
    %261 = math.rsqrt %260 : vector<1x128xf32>
    %262 = arith.mulf %257, %261 : vector<1x128xf32>
    %263 = arith.mulf %257, %210 : vector<1x128xf32>
    %264 = arith.subf %148, %263 : vector<1x128xf32>
    %265 = arith.addf %206, %263 : vector<1x128xf32>
    %266 = arith.mulf %261, %213 : vector<1x128xf32>
    %267 = arith.mulf %262, %57 : vector<1x128xf32>
    %268 = arith.subf %266, %267 : vector<1x128xf32>
    %269 = arith.mulf %262, %213 : vector<1x128xf32>
    %270 = arith.mulf %261, %57 : vector<1x128xf32>
    %271 = arith.addf %269, %270 : vector<1x128xf32>
    %272 = arith.mulf %261, %158 : vector<1x128xf32>
    %273 = arith.mulf %262, %216 : vector<1x128xf32>
    %274 = arith.subf %272, %273 : vector<1x128xf32>
    %275 = arith.mulf %262, %158 : vector<1x128xf32>
    %276 = arith.mulf %261, %216 : vector<1x128xf32>
    %277 = arith.addf %275, %276 : vector<1x128xf32>
    %278 = arith.mulf %261, %164 : vector<1x128xf32>
    %279 = arith.mulf %262, %222 : vector<1x128xf32>
    %280 = arith.subf %278, %279 : vector<1x128xf32>
    %281 = arith.mulf %262, %164 : vector<1x128xf32>
    %282 = arith.mulf %261, %222 : vector<1x128xf32>
    %283 = arith.addf %281, %282 : vector<1x128xf32>
    %284 = arith.mulf %261, %170 : vector<1x128xf32>
    %285 = arith.mulf %262, %228 : vector<1x128xf32>
    %286 = arith.subf %284, %285 : vector<1x128xf32>
    %287 = arith.mulf %262, %170 : vector<1x128xf32>
    %288 = arith.mulf %261, %228 : vector<1x128xf32>
    %289 = arith.addf %287, %288 : vector<1x128xf32>
    %290 = arith.subf %207, %264 : vector<1x128xf32>
    %291 = math.absf %268 : vector<1x128xf32>
    %cst_71 = arith.constant 9.99999991E-38 : f32
    %292 = vector.broadcast %cst_71 : f32 to vector<1x128xf32>
    %293 = arith.cmpf olt, %291, %292 : vector<1x128xf32>
    %294 = math.absf %290 : vector<1x128xf32>
    %295 = arith.mulf %290, %290 : vector<1x128xf32>
    %cst_72 = arith.constant 4.000000e+00 : f32
    %296 = vector.broadcast %cst_72 : f32 to vector<1x128xf32>
    %297 = arith.mulf %296, %268 : vector<1x128xf32>
    %298 = arith.mulf %297, %268 : vector<1x128xf32>
    %299 = arith.addf %295, %298 : vector<1x128xf32>
    %300 = math.sqrt %299 : vector<1x128xf32>
    %301 = arith.addf %294, %300 : vector<1x128xf32>
    %cst_73 = arith.constant 1.000000e+00 : f32
    %302 = vector.broadcast %cst_73 : f32 to vector<1x128xf32>
    %303 = arith.select %293, %302, %301 : vector<1x128xi1>, vector<1x128xf32>
    %cst_74 = arith.constant 0.000000e+00 : f32
    %304 = vector.broadcast %cst_74 : f32 to vector<1x128xf32>
    %305 = arith.cmpf oge, %290, %304 : vector<1x128xf32>
    %cst_75 = arith.constant 1.000000e+00 : f32
    %cst_76 = arith.constant -1.000000e+00 : f32
    %306 = vector.broadcast %cst_75 : f32 to vector<1x128xf32>
    %307 = vector.broadcast %cst_76 : f32 to vector<1x128xf32>
    %308 = arith.select %305, %306, %307 : vector<1x128xi1>, vector<1x128xf32>
    %cst_77 = arith.constant 2.000000e+00 : f32
    %309 = vector.broadcast %cst_77 : f32 to vector<1x128xf32>
    %310 = arith.mulf %309, %268 : vector<1x128xf32>
    %311 = arith.mulf %308, %310 : vector<1x128xf32>
    %312 = tpu.reciprocal %303 {approx = true} : vector<1x128xf32> -> vector<1x128xf32>
    %313 = arith.mulf %311, %312 : vector<1x128xf32>
    %cst_78 = arith.constant 0.000000e+00 : f32
    %314 = vector.broadcast %cst_78 : f32 to vector<1x128xf32>
    %315 = arith.select %293, %314, %313 : vector<1x128xi1>, vector<1x128xf32>
    %316 = arith.mulf %315, %315 : vector<1x128xf32>
    %cst_79 = arith.constant 1.000000e+00 : f32
    %317 = vector.broadcast %cst_79 : f32 to vector<1x128xf32>
    %318 = arith.addf %316, %317 : vector<1x128xf32>
    %319 = math.rsqrt %318 : vector<1x128xf32>
    %320 = arith.mulf %315, %319 : vector<1x128xf32>
    %321 = arith.mulf %315, %268 : vector<1x128xf32>
    %322 = arith.subf %264, %321 : vector<1x128xf32>
    %323 = arith.addf %207, %321 : vector<1x128xf32>
    %324 = arith.mulf %319, %57 : vector<1x128xf32>
    %325 = arith.mulf %320, %271 : vector<1x128xf32>
    %326 = arith.subf %324, %325 : vector<1x128xf32>
    %327 = arith.mulf %320, %57 : vector<1x128xf32>
    %328 = arith.mulf %319, %271 : vector<1x128xf32>
    %329 = arith.addf %327, %328 : vector<1x128xf32>
    %330 = arith.mulf %319, %274 : vector<1x128xf32>
    %331 = arith.mulf %320, %219 : vector<1x128xf32>
    %332 = arith.subf %330, %331 : vector<1x128xf32>
    %333 = arith.mulf %320, %274 : vector<1x128xf32>
    %334 = arith.mulf %319, %219 : vector<1x128xf32>
    %335 = arith.addf %333, %334 : vector<1x128xf32>
    %336 = arith.mulf %319, %280 : vector<1x128xf32>
    %337 = arith.mulf %320, %225 : vector<1x128xf32>
    %338 = arith.subf %336, %337 : vector<1x128xf32>
    %339 = arith.mulf %320, %280 : vector<1x128xf32>
    %340 = arith.mulf %319, %225 : vector<1x128xf32>
    %341 = arith.addf %339, %340 : vector<1x128xf32>
    %342 = arith.mulf %319, %286 : vector<1x128xf32>
    %343 = arith.mulf %320, %231 : vector<1x128xf32>
    %344 = arith.subf %342, %343 : vector<1x128xf32>
    %345 = arith.mulf %320, %286 : vector<1x128xf32>
    %346 = arith.mulf %319, %231 : vector<1x128xf32>
    %347 = arith.addf %345, %346 : vector<1x128xf32>
    %348 = arith.subf %323, %265 : vector<1x128xf32>
    %349 = math.absf %329 : vector<1x128xf32>
    %cst_80 = arith.constant 9.99999991E-38 : f32
    %350 = vector.broadcast %cst_80 : f32 to vector<1x128xf32>
    %351 = arith.cmpf olt, %349, %350 : vector<1x128xf32>
    %352 = math.absf %348 : vector<1x128xf32>
    %353 = arith.mulf %348, %348 : vector<1x128xf32>
    %cst_81 = arith.constant 4.000000e+00 : f32
    %354 = vector.broadcast %cst_81 : f32 to vector<1x128xf32>
    %355 = arith.mulf %354, %329 : vector<1x128xf32>
    %356 = arith.mulf %355, %329 : vector<1x128xf32>
    %357 = arith.addf %353, %356 : vector<1x128xf32>
    %358 = math.sqrt %357 : vector<1x128xf32>
    %359 = arith.addf %352, %358 : vector<1x128xf32>
    %cst_82 = arith.constant 1.000000e+00 : f32
    %360 = vector.broadcast %cst_82 : f32 to vector<1x128xf32>
    %361 = arith.select %351, %360, %359 : vector<1x128xi1>, vector<1x128xf32>
    %cst_83 = arith.constant 0.000000e+00 : f32
    %362 = vector.broadcast %cst_83 : f32 to vector<1x128xf32>
    %363 = arith.cmpf oge, %348, %362 : vector<1x128xf32>
    %cst_84 = arith.constant 1.000000e+00 : f32
    %cst_85 = arith.constant -1.000000e+00 : f32
    %364 = vector.broadcast %cst_84 : f32 to vector<1x128xf32>
    %365 = vector.broadcast %cst_85 : f32 to vector<1x128xf32>
    %366 = arith.select %363, %364, %365 : vector<1x128xi1>, vector<1x128xf32>
    %cst_86 = arith.constant 2.000000e+00 : f32
    %367 = vector.broadcast %cst_86 : f32 to vector<1x128xf32>
    %368 = arith.mulf %367, %329 : vector<1x128xf32>
    %369 = arith.mulf %366, %368 : vector<1x128xf32>
    %370 = tpu.reciprocal %361 {approx = true} : vector<1x128xf32> -> vector<1x128xf32>
    %371 = arith.mulf %369, %370 : vector<1x128xf32>
    %cst_87 = arith.constant 0.000000e+00 : f32
    %372 = vector.broadcast %cst_87 : f32 to vector<1x128xf32>
    %373 = arith.select %351, %372, %371 : vector<1x128xi1>, vector<1x128xf32>
    %374 = arith.mulf %373, %373 : vector<1x128xf32>
    %cst_88 = arith.constant 1.000000e+00 : f32
    %375 = vector.broadcast %cst_88 : f32 to vector<1x128xf32>
    %376 = arith.addf %374, %375 : vector<1x128xf32>
    %377 = math.rsqrt %376 : vector<1x128xf32>
    %378 = arith.mulf %373, %377 : vector<1x128xf32>
    %379 = arith.mulf %373, %329 : vector<1x128xf32>
    %380 = arith.subf %265, %379 : vector<1x128xf32>
    %381 = arith.addf %323, %379 : vector<1x128xf32>
    %382 = arith.mulf %377, %326 : vector<1x128xf32>
    %383 = arith.mulf %378, %57 : vector<1x128xf32>
    %384 = arith.subf %382, %383 : vector<1x128xf32>
    %385 = arith.mulf %378, %326 : vector<1x128xf32>
    %386 = arith.mulf %377, %57 : vector<1x128xf32>
    %387 = arith.addf %385, %386 : vector<1x128xf32>
    %388 = arith.mulf %377, %277 : vector<1x128xf32>
    %389 = arith.mulf %378, %335 : vector<1x128xf32>
    %390 = arith.subf %388, %389 : vector<1x128xf32>
    %391 = arith.mulf %378, %277 : vector<1x128xf32>
    %392 = arith.mulf %377, %335 : vector<1x128xf32>
    %393 = arith.addf %391, %392 : vector<1x128xf32>
    %394 = arith.mulf %377, %283 : vector<1x128xf32>
    %395 = arith.mulf %378, %341 : vector<1x128xf32>
    %396 = arith.subf %394, %395 : vector<1x128xf32>
    %397 = arith.mulf %378, %283 : vector<1x128xf32>
    %398 = arith.mulf %377, %341 : vector<1x128xf32>
    %399 = arith.addf %397, %398 : vector<1x128xf32>
    %400 = arith.mulf %377, %289 : vector<1x128xf32>
    %401 = arith.mulf %378, %347 : vector<1x128xf32>
    %402 = arith.subf %400, %401 : vector<1x128xf32>
    %403 = arith.mulf %378, %289 : vector<1x128xf32>
    %404 = arith.mulf %377, %347 : vector<1x128xf32>
    %405 = arith.addf %403, %404 : vector<1x128xf32>
    %406 = arith.subf %380, %322 : vector<1x128xf32>
    %407 = math.absf %384 : vector<1x128xf32>
    %cst_89 = arith.constant 9.99999991E-38 : f32
    %408 = vector.broadcast %cst_89 : f32 to vector<1x128xf32>
    %409 = arith.cmpf olt, %407, %408 : vector<1x128xf32>
    %410 = math.absf %406 : vector<1x128xf32>
    %411 = arith.mulf %406, %406 : vector<1x128xf32>
    %cst_90 = arith.constant 4.000000e+00 : f32
    %412 = vector.broadcast %cst_90 : f32 to vector<1x128xf32>
    %413 = arith.mulf %412, %384 : vector<1x128xf32>
    %414 = arith.mulf %413, %384 : vector<1x128xf32>
    %415 = arith.addf %411, %414 : vector<1x128xf32>
    %416 = math.sqrt %415 : vector<1x128xf32>
    %417 = arith.addf %410, %416 : vector<1x128xf32>
    %cst_91 = arith.constant 1.000000e+00 : f32
    %418 = vector.broadcast %cst_91 : f32 to vector<1x128xf32>
    %419 = arith.select %409, %418, %417 : vector<1x128xi1>, vector<1x128xf32>
    %cst_92 = arith.constant 0.000000e+00 : f32
    %420 = vector.broadcast %cst_92 : f32 to vector<1x128xf32>
    %421 = arith.cmpf oge, %406, %420 : vector<1x128xf32>
    %cst_93 = arith.constant 1.000000e+00 : f32
    %cst_94 = arith.constant -1.000000e+00 : f32
    %422 = vector.broadcast %cst_93 : f32 to vector<1x128xf32>
    %423 = vector.broadcast %cst_94 : f32 to vector<1x128xf32>
    %424 = arith.select %421, %422, %423 : vector<1x128xi1>, vector<1x128xf32>
    %cst_95 = arith.constant 2.000000e+00 : f32
    %425 = vector.broadcast %cst_95 : f32 to vector<1x128xf32>
    %426 = arith.mulf %425, %384 : vector<1x128xf32>
    %427 = arith.mulf %424, %426 : vector<1x128xf32>
    %428 = tpu.reciprocal %419 {approx = true} : vector<1x128xf32> -> vector<1x128xf32>
    %429 = arith.mulf %427, %428 : vector<1x128xf32>
    %cst_96 = arith.constant 0.000000e+00 : f32
    %430 = vector.broadcast %cst_96 : f32 to vector<1x128xf32>
    %431 = arith.select %409, %430, %429 : vector<1x128xi1>, vector<1x128xf32>
    %432 = arith.mulf %431, %431 : vector<1x128xf32>
    %cst_97 = arith.constant 1.000000e+00 : f32
    %433 = vector.broadcast %cst_97 : f32 to vector<1x128xf32>
    %434 = arith.addf %432, %433 : vector<1x128xf32>
    %435 = math.rsqrt %434 : vector<1x128xf32>
    %436 = arith.mulf %431, %435 : vector<1x128xf32>
    %437 = arith.mulf %431, %384 : vector<1x128xf32>
    %438 = arith.subf %322, %437 : vector<1x128xf32>
    %439 = arith.addf %380, %437 : vector<1x128xf32>
    %440 = arith.mulf %435, %387 : vector<1x128xf32>
    %441 = arith.mulf %436, %57 : vector<1x128xf32>
    %442 = arith.subf %440, %441 : vector<1x128xf32>
    %443 = arith.mulf %436, %387 : vector<1x128xf32>
    %444 = arith.mulf %435, %57 : vector<1x128xf32>
    %445 = arith.addf %443, %444 : vector<1x128xf32>
    %446 = arith.mulf %435, %332 : vector<1x128xf32>
    %447 = arith.mulf %436, %390 : vector<1x128xf32>
    %448 = arith.subf %446, %447 : vector<1x128xf32>
    %449 = arith.mulf %436, %332 : vector<1x128xf32>
    %450 = arith.mulf %435, %390 : vector<1x128xf32>
    %451 = arith.addf %449, %450 : vector<1x128xf32>
    %452 = arith.mulf %435, %338 : vector<1x128xf32>
    %453 = arith.mulf %436, %396 : vector<1x128xf32>
    %454 = arith.subf %452, %453 : vector<1x128xf32>
    %455 = arith.mulf %436, %338 : vector<1x128xf32>
    %456 = arith.mulf %435, %396 : vector<1x128xf32>
    %457 = arith.addf %455, %456 : vector<1x128xf32>
    %458 = arith.mulf %435, %344 : vector<1x128xf32>
    %459 = arith.mulf %436, %402 : vector<1x128xf32>
    %460 = arith.subf %458, %459 : vector<1x128xf32>
    %461 = arith.mulf %436, %344 : vector<1x128xf32>
    %462 = arith.mulf %435, %402 : vector<1x128xf32>
    %463 = arith.addf %461, %462 : vector<1x128xf32>
    %464 = arith.subf %381, %438 : vector<1x128xf32>
    %465 = math.absf %442 : vector<1x128xf32>
    %cst_98 = arith.constant 9.99999991E-38 : f32
    %466 = vector.broadcast %cst_98 : f32 to vector<1x128xf32>
    %467 = arith.cmpf olt, %465, %466 : vector<1x128xf32>
    %468 = math.absf %464 : vector<1x128xf32>
    %469 = arith.mulf %464, %464 : vector<1x128xf32>
    %cst_99 = arith.constant 4.000000e+00 : f32
    %470 = vector.broadcast %cst_99 : f32 to vector<1x128xf32>
    %471 = arith.mulf %470, %442 : vector<1x128xf32>
    %472 = arith.mulf %471, %442 : vector<1x128xf32>
    %473 = arith.addf %469, %472 : vector<1x128xf32>
    %474 = math.sqrt %473 : vector<1x128xf32>
    %475 = arith.addf %468, %474 : vector<1x128xf32>
    %cst_100 = arith.constant 1.000000e+00 : f32
    %476 = vector.broadcast %cst_100 : f32 to vector<1x128xf32>
    %477 = arith.select %467, %476, %475 : vector<1x128xi1>, vector<1x128xf32>
    %cst_101 = arith.constant 0.000000e+00 : f32
    %478 = vector.broadcast %cst_101 : f32 to vector<1x128xf32>
    %479 = arith.cmpf oge, %464, %478 : vector<1x128xf32>
    %cst_102 = arith.constant 1.000000e+00 : f32
    %cst_103 = arith.constant -1.000000e+00 : f32
    %480 = vector.broadcast %cst_102 : f32 to vector<1x128xf32>
    %481 = vector.broadcast %cst_103 : f32 to vector<1x128xf32>
    %482 = arith.select %479, %480, %481 : vector<1x128xi1>, vector<1x128xf32>
    %cst_104 = arith.constant 2.000000e+00 : f32
    %483 = vector.broadcast %cst_104 : f32 to vector<1x128xf32>
    %484 = arith.mulf %483, %442 : vector<1x128xf32>
    %485 = arith.mulf %482, %484 : vector<1x128xf32>
    %486 = tpu.reciprocal %477 {approx = true} : vector<1x128xf32> -> vector<1x128xf32>
    %487 = arith.mulf %485, %486 : vector<1x128xf32>
    %cst_105 = arith.constant 0.000000e+00 : f32
    %488 = vector.broadcast %cst_105 : f32 to vector<1x128xf32>
    %489 = arith.select %467, %488, %487 : vector<1x128xi1>, vector<1x128xf32>
    %490 = arith.mulf %489, %489 : vector<1x128xf32>
    %cst_106 = arith.constant 1.000000e+00 : f32
    %491 = vector.broadcast %cst_106 : f32 to vector<1x128xf32>
    %492 = arith.addf %490, %491 : vector<1x128xf32>
    %493 = math.rsqrt %492 : vector<1x128xf32>
    %494 = arith.mulf %489, %493 : vector<1x128xf32>
    %495 = arith.mulf %489, %442 : vector<1x128xf32>
    %496 = arith.subf %438, %495 : vector<1x128xf32>
    %497 = arith.addf %381, %495 : vector<1x128xf32>
    %498 = arith.mulf %494, %57 : vector<1x128xf32>
    %499 = arith.mulf %493, %445 : vector<1x128xf32>
    %500 = arith.addf %498, %499 : vector<1x128xf32>
    %501 = arith.mulf %493, %448 : vector<1x128xf32>
    %502 = arith.mulf %494, %393 : vector<1x128xf32>
    %503 = arith.subf %501, %502 : vector<1x128xf32>
    %504 = arith.mulf %494, %448 : vector<1x128xf32>
    %505 = arith.mulf %493, %393 : vector<1x128xf32>
    %506 = arith.addf %504, %505 : vector<1x128xf32>
    %507 = arith.mulf %493, %454 : vector<1x128xf32>
    %508 = arith.mulf %494, %399 : vector<1x128xf32>
    %509 = arith.subf %507, %508 : vector<1x128xf32>
    %510 = arith.mulf %494, %454 : vector<1x128xf32>
    %511 = arith.mulf %493, %399 : vector<1x128xf32>
    %512 = arith.addf %510, %511 : vector<1x128xf32>
    %513 = arith.mulf %493, %460 : vector<1x128xf32>
    %514 = arith.mulf %494, %405 : vector<1x128xf32>
    %515 = arith.subf %513, %514 : vector<1x128xf32>
    %516 = arith.mulf %494, %460 : vector<1x128xf32>
    %517 = arith.mulf %493, %405 : vector<1x128xf32>
    %518 = arith.addf %516, %517 : vector<1x128xf32>
    %519 = arith.subf %497, %439 : vector<1x128xf32>
    %520 = math.absf %500 : vector<1x128xf32>
    %cst_107 = arith.constant 9.99999991E-38 : f32
    %521 = vector.broadcast %cst_107 : f32 to vector<1x128xf32>
    %522 = arith.cmpf olt, %520, %521 : vector<1x128xf32>
    %523 = math.absf %519 : vector<1x128xf32>
    %524 = arith.mulf %519, %519 : vector<1x128xf32>
    %cst_108 = arith.constant 4.000000e+00 : f32
    %525 = vector.broadcast %cst_108 : f32 to vector<1x128xf32>
    %526 = arith.mulf %525, %500 : vector<1x128xf32>
    %527 = arith.mulf %526, %500 : vector<1x128xf32>
    %528 = arith.addf %524, %527 : vector<1x128xf32>
    %529 = math.sqrt %528 : vector<1x128xf32>
    %530 = arith.addf %523, %529 : vector<1x128xf32>
    %cst_109 = arith.constant 1.000000e+00 : f32
    %531 = vector.broadcast %cst_109 : f32 to vector<1x128xf32>
    %532 = arith.select %522, %531, %530 : vector<1x128xi1>, vector<1x128xf32>
    %cst_110 = arith.constant 0.000000e+00 : f32
    %533 = vector.broadcast %cst_110 : f32 to vector<1x128xf32>
    %534 = arith.cmpf oge, %519, %533 : vector<1x128xf32>
    %cst_111 = arith.constant 1.000000e+00 : f32
    %cst_112 = arith.constant -1.000000e+00 : f32
    %535 = vector.broadcast %cst_111 : f32 to vector<1x128xf32>
    %536 = vector.broadcast %cst_112 : f32 to vector<1x128xf32>
    %537 = arith.select %534, %535, %536 : vector<1x128xi1>, vector<1x128xf32>
    %cst_113 = arith.constant 2.000000e+00 : f32
    %538 = vector.broadcast %cst_113 : f32 to vector<1x128xf32>
    %539 = arith.mulf %538, %500 : vector<1x128xf32>
    %540 = arith.mulf %537, %539 : vector<1x128xf32>
    %541 = tpu.reciprocal %532 {approx = true} : vector<1x128xf32> -> vector<1x128xf32>
    %542 = arith.mulf %540, %541 : vector<1x128xf32>
    %cst_114 = arith.constant 0.000000e+00 : f32
    %543 = vector.broadcast %cst_114 : f32 to vector<1x128xf32>
    %544 = arith.select %522, %543, %542 : vector<1x128xi1>, vector<1x128xf32>
    %545 = arith.mulf %544, %544 : vector<1x128xf32>
    %cst_115 = arith.constant 1.000000e+00 : f32
    %546 = vector.broadcast %cst_115 : f32 to vector<1x128xf32>
    %547 = arith.addf %545, %546 : vector<1x128xf32>
    %548 = math.rsqrt %547 : vector<1x128xf32>
    %549 = arith.mulf %544, %548 : vector<1x128xf32>
    %550 = arith.mulf %544, %500 : vector<1x128xf32>
    %551 = arith.subf %439, %550 : vector<1x128xf32>
    %552 = arith.addf %497, %550 : vector<1x128xf32>
    %553 = arith.mulf %548, %451 : vector<1x128xf32>
    %554 = arith.mulf %549, %506 : vector<1x128xf32>
    %555 = arith.subf %553, %554 : vector<1x128xf32>
    %556 = arith.mulf %549, %451 : vector<1x128xf32>
    %557 = arith.mulf %548, %506 : vector<1x128xf32>
    %558 = arith.addf %556, %557 : vector<1x128xf32>
    %559 = arith.mulf %548, %457 : vector<1x128xf32>
    %560 = arith.mulf %549, %512 : vector<1x128xf32>
    %561 = arith.subf %559, %560 : vector<1x128xf32>
    %562 = arith.mulf %549, %457 : vector<1x128xf32>
    %563 = arith.mulf %548, %512 : vector<1x128xf32>
    %564 = arith.addf %562, %563 : vector<1x128xf32>
    %565 = arith.mulf %548, %463 : vector<1x128xf32>
    %566 = arith.mulf %549, %518 : vector<1x128xf32>
    %567 = arith.subf %565, %566 : vector<1x128xf32>
    %568 = arith.mulf %549, %463 : vector<1x128xf32>
    %569 = arith.mulf %548, %518 : vector<1x128xf32>
    %570 = arith.addf %568, %569 : vector<1x128xf32>
    %571 = arith.cmpf ogt, %496, %551 : vector<1x128xf32>
    %572 = arith.select %571, %551, %496 : vector<1x128xi1>, vector<1x128xf32>
    %573 = arith.select %571, %496, %551 : vector<1x128xi1>, vector<1x128xf32>
    %574 = arith.select %571, %555, %503 : vector<1x128xi1>, vector<1x128xf32>
    %575 = arith.select %571, %561, %509 : vector<1x128xi1>, vector<1x128xf32>
    %576 = arith.select %571, %567, %515 : vector<1x128xi1>, vector<1x128xf32>
    %577 = arith.select %571, %503, %555 : vector<1x128xi1>, vector<1x128xf32>
    %578 = arith.select %571, %509, %561 : vector<1x128xi1>, vector<1x128xf32>
    %579 = arith.select %571, %515, %567 : vector<1x128xi1>, vector<1x128xf32>
    %580 = arith.cmpf ogt, %572, %552 : vector<1x128xf32>
    %581 = arith.select %580, %572, %552 : vector<1x128xi1>, vector<1x128xf32>
    %582 = arith.select %580, %558, %574 : vector<1x128xi1>, vector<1x128xf32>
    %583 = arith.select %580, %564, %575 : vector<1x128xi1>, vector<1x128xf32>
    %584 = arith.select %580, %570, %576 : vector<1x128xi1>, vector<1x128xf32>
    %585 = arith.select %580, %574, %558 : vector<1x128xi1>, vector<1x128xf32>
    %586 = arith.select %580, %575, %564 : vector<1x128xi1>, vector<1x128xf32>
    %587 = arith.select %580, %576, %570 : vector<1x128xi1>, vector<1x128xf32>
    %588 = arith.cmpf ogt, %573, %581 : vector<1x128xf32>
    %589 = arith.select %588, %577, %585 : vector<1x128xi1>, vector<1x128xf32>
    %590 = arith.select %588, %578, %586 : vector<1x128xi1>, vector<1x128xf32>
    %591 = arith.select %588, %579, %587 : vector<1x128xi1>, vector<1x128xf32>
    %592 = arith.mulf %582, %582 : vector<1x128xf32>
    %593 = arith.mulf %583, %583 : vector<1x128xf32>
    %594 = arith.addf %592, %593 : vector<1x128xf32>
    %595 = arith.mulf %584, %584 : vector<1x128xf32>
    %596 = arith.addf %594, %595 : vector<1x128xf32>
    %cst_116 = arith.constant 9.99999996E-13 : f32
    %597 = vector.broadcast %cst_116 : f32 to vector<1x128xf32>
    %598 = arith.addf %596, %597 : vector<1x128xf32>
    %599 = math.rsqrt %598 : vector<1x128xf32>
    %600 = arith.mulf %582, %599 : vector<1x128xf32>
    %601 = arith.mulf %583, %599 : vector<1x128xf32>
    %602 = arith.mulf %584, %599 : vector<1x128xf32>
    %603 = arith.mulf %589, %589 : vector<1x128xf32>
    %604 = arith.mulf %590, %590 : vector<1x128xf32>
    %605 = arith.addf %603, %604 : vector<1x128xf32>
    %606 = arith.mulf %591, %591 : vector<1x128xf32>
    %607 = arith.addf %605, %606 : vector<1x128xf32>
    %cst_117 = arith.constant 9.99999996E-13 : f32
    %608 = vector.broadcast %cst_117 : f32 to vector<1x128xf32>
    %609 = arith.addf %607, %608 : vector<1x128xf32>
    %610 = math.rsqrt %609 : vector<1x128xf32>
    %611 = arith.mulf %589, %610 : vector<1x128xf32>
    %612 = arith.mulf %590, %610 : vector<1x128xf32>
    %613 = arith.mulf %591, %610 : vector<1x128xf32>
    %c48 = arith.constant 48 : index
    %c0_118 = arith.constant 0 : index
    %614 = vector.load %arg4[%c48, %c0_118] : memref<96x128xf32, #tpu.memory_space<vmem>>, vector<1x128xf32>
    tpu.vector_store %arg4[%c48, %c0_118], %600 {strides = array<i32>} : memref<96x128xf32, #tpu.memory_space<vmem>>, vector<1x128xf32>,
    %c72 = arith.constant 72 : index
    %c0_119 = arith.constant 0 : index
    %615 = vector.load %arg4[%c72, %c0_119] : memref<96x128xf32, #tpu.memory_space<vmem>>, vector<1x128xf32>
    tpu.vector_store %arg4[%c72, %c0_119], %611 {strides = array<i32>} : memref<96x128xf32, #tpu.memory_space<vmem>>, vector<1x128xf32>,
    %c56 = arith.constant 56 : index
    %c0_120 = arith.constant 0 : index
    %616 = vector.load %arg4[%c56, %c0_120] : memref<96x128xf32, #tpu.memory_space<vmem>>, vector<1x128xf32>
    tpu.vector_store %arg4[%c56, %c0_120], %601 {strides = array<i32>} : memref<96x128xf32, #tpu.memory_space<vmem>>, vector<1x128xf32>,
    %c80 = arith.constant 80 : index
    %c0_121 = arith.constant 0 : index
    %617 = vector.load %arg4[%c80, %c0_121] : memref<96x128xf32, #tpu.memory_space<vmem>>, vector<1x128xf32>
    tpu.vector_store %arg4[%c80, %c0_121], %612 {strides = array<i32>} : memref<96x128xf32, #tpu.memory_space<vmem>>, vector<1x128xf32>,
    %c64 = arith.constant 64 : index
    %c0_122 = arith.constant 0 : index
    %618 = vector.load %arg4[%c64, %c0_122] : memref<96x128xf32, #tpu.memory_space<vmem>>, vector<1x128xf32>
    tpu.vector_store %arg4[%c64, %c0_122], %602 {strides = array<i32>} : memref<96x128xf32, #tpu.memory_space<vmem>>, vector<1x128xf32>,
    %c88 = arith.constant 88 : index
    %c0_123 = arith.constant 0 : index
    %619 = vector.load %arg4[%c88, %c0_123] : memref<96x128xf32, #tpu.memory_space<vmem>>, vector<1x128xf32>
    tpu.vector_store %arg4[%c88, %c0_123], %613 {strides = array<i32>} : memref<96x128xf32, #tpu.memory_space<vmem>>, vector<1x128xf32>,
    %c0_124 = arith.constant 0 : index
    %c0_125 = arith.constant 0 : index
    %c0_126 = arith.constant 0 : index
    %620 = vector.load %arg1[%c0_124, %c0_125, %c0_126] : memref<3x32x128xf32, #tpu.memory_space<vmem>>, vector<1x32x128xf32>
    %621 = vector.shape_cast %620 : vector<1x32x128xf32> to vector<32x128xf32>
    %c1_127 = arith.constant 1 : index
    %c0_128 = arith.constant 0 : index
    %c0_129 = arith.constant 0 : index
    %622 = vector.load %arg1[%c1_127, %c0_128, %c0_129] : memref<3x32x128xf32, #tpu.memory_space<vmem>>, vector<1x32x128xf32>
    %623 = vector.shape_cast %622 : vector<1x32x128xf32> to vector<32x128xf32>
    %c2_130 = arith.constant 2 : index
    %c0_131 = arith.constant 0 : index
    %c0_132 = arith.constant 0 : index
    %624 = vector.load %arg1[%c2_130, %c0_131, %c0_132] : memref<3x32x128xf32, #tpu.memory_space<vmem>>, vector<1x32x128xf32>
    %625 = vector.shape_cast %624 : vector<1x32x128xf32> to vector<32x128xf32>
    %c48_133 = arith.constant 48 : index
    %c0_134 = arith.constant 0 : index
    %626 = vector.load %arg4[%c48_133, %c0_134] : memref<96x128xf32, #tpu.memory_space<vmem>>, vector<1x128xf32>
    %c56_135 = arith.constant 56 : index
    %c0_136 = arith.constant 0 : index
    %627 = vector.load %arg4[%c56_135, %c0_136] : memref<96x128xf32, #tpu.memory_space<vmem>>, vector<1x128xf32>
    %c64_137 = arith.constant 64 : index
    %c0_138 = arith.constant 0 : index
    %628 = vector.load %arg4[%c64_137, %c0_138] : memref<96x128xf32, #tpu.memory_space<vmem>>, vector<1x128xf32>
    %629 = vector.broadcast %626 : vector<1x128xf32> to vector<32x128xf32>
    %630 = arith.mulf %629, %621 : vector<32x128xf32>
    %631 = vector.broadcast %627 : vector<1x128xf32> to vector<32x128xf32>
    %632 = arith.mulf %631, %623 : vector<32x128xf32>
    %633 = arith.addf %630, %632 : vector<32x128xf32>
    %634 = vector.broadcast %628 : vector<1x128xf32> to vector<32x128xf32>
    %635 = arith.mulf %634, %625 : vector<32x128xf32>
    %636 = arith.addf %633, %635 : vector<32x128xf32>
    %cst_139 = arith.constant 0.000000e+00 : f32
    %637 = vector.broadcast %cst_139 : f32 to vector<32x128xf32>
    %638 = arith.cmpf ogt, %636, %637 : vector<32x128xf32>
    %639 = arith.extui %638 : vector<32x128xi1> to vector<32x128xi32>
    %640 = arith.sitofp %639 : vector<32x128xi32> to vector<32x128xf32>
    %cst_140 = arith.constant dense<0.000000e+00> : vector<128xf32>
    %641 = vector.multi_reduction <add>, %640, %cst_140 [0] : vector<32x128xf32> to vector<128xf32>
    %642 = vector.shape_cast %641 : vector<128xf32> to vector<1x128xf32>
    %cst_141 = arith.constant 1.600000e+01 : f32
    %643 = vector.broadcast %cst_141 : f32 to vector<1x128xf32>
    %644 = arith.cmpf olt, %642, %643 : vector<1x128xf32>
    %cst_142 = arith.constant -1.000000e+00 : f32
    %cst_143 = arith.constant 1.000000e+00 : f32
    %645 = vector.broadcast %cst_142 : f32 to vector<1x128xf32>
    %646 = vector.broadcast %cst_143 : f32 to vector<1x128xf32>
    %647 = arith.select %644, %645, %646 : vector<1x128xi1>, vector<1x128xf32>
    %648 = arith.mulf %647, %626 : vector<1x128xf32>
    %649 = arith.mulf %647, %627 : vector<1x128xf32>
    %650 = arith.mulf %647, %628 : vector<1x128xf32>
    %c72_144 = arith.constant 72 : index
    %c0_145 = arith.constant 0 : index
    %651 = vector.load %arg4[%c72_144, %c0_145] : memref<96x128xf32, #tpu.memory_space<vmem>>, vector<1x128xf32>
    %c80_146 = arith.constant 80 : index
    %c0_147 = arith.constant 0 : index
    %652 = vector.load %arg4[%c80_146, %c0_147] : memref<96x128xf32, #tpu.memory_space<vmem>>, vector<1x128xf32>
    %c88_148 = arith.constant 88 : index
    %c0_149 = arith.constant 0 : index
    %653 = vector.load %arg4[%c88_148, %c0_149] : memref<96x128xf32, #tpu.memory_space<vmem>>, vector<1x128xf32>
    %654 = vector.broadcast %651 : vector<1x128xf32> to vector<32x128xf32>
    %655 = arith.mulf %654, %621 : vector<32x128xf32>
    %656 = vector.broadcast %652 : vector<1x128xf32> to vector<32x128xf32>
    %657 = arith.mulf %656, %623 : vector<32x128xf32>
    %658 = arith.addf %655, %657 : vector<32x128xf32>
    %659 = vector.broadcast %653 : vector<1x128xf32> to vector<32x128xf32>
    %660 = arith.mulf %659, %625 : vector<32x128xf32>
    %661 = arith.addf %658, %660 : vector<32x128xf32>
    %cst_150 = arith.constant 0.000000e+00 : f32
    %662 = vector.broadcast %cst_150 : f32 to vector<32x128xf32>
    %663 = arith.cmpf ogt, %661, %662 : vector<32x128xf32>
    %664 = arith.extui %663 : vector<32x128xi1> to vector<32x128xi32>
    %665 = arith.sitofp %664 : vector<32x128xi32> to vector<32x128xf32>
    %cst_151 = arith.constant dense<0.000000e+00> : vector<128xf32>
    %666 = vector.multi_reduction <add>, %665, %cst_151 [0] : vector<32x128xf32> to vector<128xf32>
    %667 = vector.shape_cast %666 : vector<128xf32> to vector<1x128xf32>
    %cst_152 = arith.constant 1.600000e+01 : f32
    %668 = vector.broadcast %cst_152 : f32 to vector<1x128xf32>
    %669 = arith.cmpf olt, %667, %668 : vector<1x128xf32>
    %cst_153 = arith.constant -1.000000e+00 : f32
    %cst_154 = arith.constant 1.000000e+00 : f32
    %670 = vector.broadcast %cst_153 : f32 to vector<1x128xf32>
    %671 = vector.broadcast %cst_154 : f32 to vector<1x128xf32>
    %672 = arith.select %669, %670, %671 : vector<1x128xi1>, vector<1x128xf32>
    %673 = arith.mulf %672, %651 : vector<1x128xf32>
    %674 = arith.mulf %672, %652 : vector<1x128xf32>
    %675 = arith.mulf %672, %653 : vector<1x128xf32>
    %676 = arith.mulf %649, %675 : vector<1x128xf32>
    %677 = arith.mulf %650, %674 : vector<1x128xf32>
    %678 = arith.subf %676, %677 : vector<1x128xf32>
    %679 = arith.mulf %650, %673 : vector<1x128xf32>
    %680 = arith.mulf %648, %675 : vector<1x128xf32>
    %681 = arith.subf %679, %680 : vector<1x128xf32>
    %682 = arith.mulf %648, %674 : vector<1x128xf32>
    %683 = arith.mulf %649, %673 : vector<1x128xf32>
    %684 = arith.subf %682, %683 : vector<1x128xf32>
    %c0_155 = arith.constant 0 : index
    %c0_156 = arith.constant 0 : index
    %685 = vector.load %arg3[%c0_155, %c0_156] : memref<9x128xf32, #tpu.memory_space<vmem>>, vector<1x128xf32>
    tpu.vector_store %arg3[%c0_155, %c0_156], %648 {strides = array<i32>} : memref<9x128xf32, #tpu.memory_space<vmem>>, vector<1x128xf32>,
    %c1_157 = arith.constant 1 : index
    %c0_158 = arith.constant 0 : index
    %686 = vector.load %arg3[%c1_157, %c0_158] : memref<9x128xf32, #tpu.memory_space<vmem>>, vector<1x128xf32>
    tpu.vector_store %arg3[%c1_157, %c0_158], %678 {strides = array<i32>} : memref<9x128xf32, #tpu.memory_space<vmem>>, vector<1x128xf32>,
    %c2_159 = arith.constant 2 : index
    %c0_160 = arith.constant 0 : index
    %687 = vector.load %arg3[%c2_159, %c0_160] : memref<9x128xf32, #tpu.memory_space<vmem>>, vector<1x128xf32>
    tpu.vector_store %arg3[%c2_159, %c0_160], %673 {strides = array<i32>} : memref<9x128xf32, #tpu.memory_space<vmem>>, vector<1x128xf32>,
    %c3 = arith.constant 3 : index
    %c0_161 = arith.constant 0 : index
    %688 = vector.load %arg3[%c3, %c0_161] : memref<9x128xf32, #tpu.memory_space<vmem>>, vector<1x128xf32>
    tpu.vector_store %arg3[%c3, %c0_161], %649 {strides = array<i32>} : memref<9x128xf32, #tpu.memory_space<vmem>>, vector<1x128xf32>,
    %c4 = arith.constant 4 : index
    %c0_162 = arith.constant 0 : index
    %689 = vector.load %arg3[%c4, %c0_162] : memref<9x128xf32, #tpu.memory_space<vmem>>, vector<1x128xf32>
    tpu.vector_store %arg3[%c4, %c0_162], %681 {strides = array<i32>} : memref<9x128xf32, #tpu.memory_space<vmem>>, vector<1x128xf32>,
    %c5 = arith.constant 5 : index
    %c0_163 = arith.constant 0 : index
    %690 = vector.load %arg3[%c5, %c0_163] : memref<9x128xf32, #tpu.memory_space<vmem>>, vector<1x128xf32>
    tpu.vector_store %arg3[%c5, %c0_163], %674 {strides = array<i32>} : memref<9x128xf32, #tpu.memory_space<vmem>>, vector<1x128xf32>,
    %c6 = arith.constant 6 : index
    %c0_164 = arith.constant 0 : index
    %691 = vector.load %arg3[%c6, %c0_164] : memref<9x128xf32, #tpu.memory_space<vmem>>, vector<1x128xf32>
    tpu.vector_store %arg3[%c6, %c0_164], %650 {strides = array<i32>} : memref<9x128xf32, #tpu.memory_space<vmem>>, vector<1x128xf32>,
    %c7 = arith.constant 7 : index
    %c0_165 = arith.constant 0 : index
    %692 = vector.load %arg3[%c7, %c0_165] : memref<9x128xf32, #tpu.memory_space<vmem>>, vector<1x128xf32>
    tpu.vector_store %arg3[%c7, %c0_165], %684 {strides = array<i32>} : memref<9x128xf32, #tpu.memory_space<vmem>>, vector<1x128xf32>,
    %c8_166 = arith.constant 8 : index
    %c0_167 = arith.constant 0 : index
    %693 = vector.load %arg3[%c8_166, %c0_167] : memref<9x128xf32, #tpu.memory_space<vmem>>, vector<1x128xf32>
    tpu.vector_store %arg3[%c8_166, %c0_167], %675 {strides = array<i32>} : memref<9x128xf32, #tpu.memory_space<vmem>>, vector<1x128xf32>,
    %694 = vector.broadcast %648 : vector<1x128xf32> to vector<32x128xf32>
    %695 = arith.mulf %621, %694 : vector<32x128xf32>
    %696 = vector.broadcast %649 : vector<1x128xf32> to vector<32x128xf32>
    %697 = arith.mulf %623, %696 : vector<32x128xf32>
    %698 = arith.addf %695, %697 : vector<32x128xf32>
    %699 = vector.broadcast %650 : vector<1x128xf32> to vector<32x128xf32>
    %700 = arith.mulf %625, %699 : vector<32x128xf32>
    %701 = arith.addf %698, %700 : vector<32x128xf32>
    %c0_168 = arith.constant 0 : index
    %c0_169 = arith.constant 0 : index
    %c0_170 = arith.constant 0 : index
    %702 = vector.load %arg2[%c0_168, %c0_169, %c0_170] : memref<3x32x128xf32, #tpu.memory_space<vmem>>, vector<1x32x128xf32>
    %703 = vector.shape_cast %702 : vector<1x32x128xf32> to vector<32x128xf32>
    %704 = vector.shape_cast %701 : vector<32x128xf32> to vector<1x32x128xf32>
    tpu.vector_store %arg2[%c0_168, %c0_169, %c0_170], %704 {strides = array<i32>} : memref<3x32x128xf32, #tpu.memory_space<vmem>>, vector<1x32x128xf32>,
    %705 = vector.broadcast %678 : vector<1x128xf32> to vector<32x128xf32>
    %706 = arith.mulf %621, %705 : vector<32x128xf32>
    %707 = vector.broadcast %681 : vector<1x128xf32> to vector<32x128xf32>
    %708 = arith.mulf %623, %707 : vector<32x128xf32>
    %709 = arith.addf %706, %708 : vector<32x128xf32>
    %710 = vector.broadcast %684 : vector<1x128xf32> to vector<32x128xf32>
    %711 = arith.mulf %625, %710 : vector<32x128xf32>
    %712 = arith.addf %709, %711 : vector<32x128xf32>
    %c1_171 = arith.constant 1 : index
    %c0_172 = arith.constant 0 : index
    %c0_173 = arith.constant 0 : index
    %713 = vector.load %arg2[%c1_171, %c0_172, %c0_173] : memref<3x32x128xf32, #tpu.memory_space<vmem>>, vector<1x32x128xf32>
    %714 = vector.shape_cast %713 : vector<1x32x128xf32> to vector<32x128xf32>
    %715 = vector.shape_cast %712 : vector<32x128xf32> to vector<1x32x128xf32>
    tpu.vector_store %arg2[%c1_171, %c0_172, %c0_173], %715 {strides = array<i32>} : memref<3x32x128xf32, #tpu.memory_space<vmem>>, vector<1x32x128xf32>,
    %716 = vector.broadcast %673 : vector<1x128xf32> to vector<32x128xf32>
    %717 = arith.mulf %621, %716 : vector<32x128xf32>
    %718 = vector.broadcast %674 : vector<1x128xf32> to vector<32x128xf32>
    %719 = arith.mulf %623, %718 : vector<32x128xf32>
    %720 = arith.addf %717, %719 : vector<32x128xf32>
    %721 = vector.broadcast %675 : vector<1x128xf32> to vector<32x128xf32>
    %722 = arith.mulf %625, %721 : vector<32x128xf32>
    %723 = arith.addf %720, %722 : vector<32x128xf32>
    %c2_174 = arith.constant 2 : index
    %c0_175 = arith.constant 0 : index
    %c0_176 = arith.constant 0 : index
    %724 = vector.load %arg2[%c2_174, %c0_175, %c0_176] : memref<3x32x128xf32, #tpu.memory_space<vmem>>, vector<1x32x128xf32>
    %725 = vector.shape_cast %724 : vector<1x32x128xf32> to vector<32x128xf32>
    %726 = vector.shape_cast %723 : vector<32x128xf32> to vector<1x32x128xf32>
    tpu.vector_store %arg2[%c2_174, %c0_175, %c0_176], %726 {strides = array<i32>} : memref<3x32x128xf32, #tpu.memory_space<vmem>>, vector<1x32x128xf32>,
    return
  }
  func.func @transform_0(%arg0: i32) -> (i32, i32, i32) {
    %c0_i32 = arith.constant 0 : i32
    %c0_i32_0 = arith.constant 0 : i32
    %c0_i32_1 = arith.constant 0 : i32
    return %c0_i32, %c0_i32_0, %arg0 : i32, i32, i32
  }
  func.func @transform_1(%arg0: i32) -> (i32, i32, i32) {
    %c0_i32 = arith.constant 0 : i32
    %c0_i32_0 = arith.constant 0 : i32
    %c0_i32_1 = arith.constant 0 : i32
    return %c0_i32, %c0_i32_0, %arg0 : i32, i32, i32
  }
  func.func @transform_2(%arg0: i32) -> (i32, i32) {
    %c0_i32 = arith.constant 0 : i32
    %c0_i32_0 = arith.constant 0 : i32
    return %c0_i32, %arg0 : i32, i32
  }
}

</mosaic_0001>

<bundles_post_ra>
// kernel: lrf_forward.1
= control target key start
LH: loop header
LB: loop body
LE: loop exit
PB: predicated region body
PF: predicated region fallthrough
CT: control target
= control target key end

     0   :  { %s1875_s0 = inlined_call_operand.vmem [shape: f32[3,32,128], index: 0, kind: input, shape index: {}]   ;;  %s1876_s2 = inlined_call_operand.vmem [shape: f32[9,128], index: 2, kind: output, shape index: {1}]   ;;  %s1877_s1 = inlined_call_operand.vmem [shape: f32[3,32,128], index: 1, kind: output, shape index: {0}]  }
   0x1   :  { %v1238_v0 = vld [vmem:[%s1875_s0] sm:$0xff]  ;;  %v1243_v1 = vld [vmem:[%s1875_s0 + $0x8] sm:$0xff]  ;;  %v1248_v2 = vld [vmem:[%s1875_s0 + $0x10] sm:$0xff] }
   0x2   :  { %v1253_v3 = vld [vmem:[%s1875_s0 + $0x18] sm:$0xff]  ;;  %v1258_v4 = vld [vmem:[%s1875_s0 + $0x20] sm:$0xff]  ;;  %v1263_v5 = vld [vmem:[%s1875_s0 + $0x28] sm:$0xff]  ;;  %v24_v6 = vmul.f32 %v1238_v0, %v1238_v0  ;;  %v25_v7 = vmul.f32 %v1243_v1, %v1243_v1  ;;  %v26_v8 = vmul.f32 %v1248_v2, %v1248_v2 }
   0x3   :  { %v1274_v9 = vld [vmem:[%s1875_s0 + $0x30] sm:$0xff]  ;;  %v1279_v10 = vld [vmem:[%s1875_s0 + $0x38] sm:$0xff]  ;;  %v1284_v11 = vld [vmem:[%s1875_s0 + $0x40] sm:$0xff]  ;;  %v27_v12 = vmul.f32 %v1253_v3, %v1253_v3  ;;  %v28_v13 = vmul.f32 %v1258_v4, %v1258_v4  ;;  %v29_v14 = vmul.f32 %v1263_v5, %v1263_v5 }
   0x4   :  { %v1295_v15 = vld [vmem:[%s1875_s0 + $0x48] sm:$0xff]  ;;  %v1300_v16 = vld [vmem:[%s1875_s0 + $0x50] sm:$0xff]  ;;  %v1305_v17 = vld [vmem:[%s1875_s0 + $0x58] sm:$0xff]  ;;  %v30_v18 = vmul.f32 %v1274_v9, %v1274_v9  ;;  %v31_v19 = vmul.f32 %v1279_v10, %v1279_v10  ;;  %v36_v20 = vmul.f32 %v1284_v11, %v1284_v11 }
   0x5   :  { %v32_v21 = vadd.f32 %v28_v13, %v24_v6  ;;  %v33_v22 = vadd.f32 %v29_v14, %v25_v7  ;;  %v37_v23 = vmul.f32 %v1295_v15, %v1295_v15  ;;  %v38_v24 = vmul.f32 %v1300_v16, %v1300_v16 }
   0x6   :  { %v34_v25 = vadd.f32 %v30_v18, %v26_v8  ;;  %v35_v26 = vadd.f32 %v31_v19, %v27_v12  ;;  %v39_v27 = vmul.f32 %v1305_v17, %v1305_v17 }
   0x7   :  { %v40_v28 = vadd.f32 %v36_v20, %v32_v21  ;;  %v41_v29 = vadd.f32 %v37_v23, %v33_v22 }
   0x8   :  { %v42_v30 = vadd.f32 %v38_v24, %v34_v25  ;;  %v43_v31 = vadd.f32 %v39_v27, %v35_v26 }
   0x9   :  { %1149 = vrsqrt.f32 %v40_v28  ;;  %vm51_vm0 = vcmp.eq.f32.partialorder %v40_v28, inf  ;;  %vm53_vm1 = vcmp.eq.f32.partialorder %v40_v28, 0.0  ;;  %v54_v51 = vand.u32 2147483648, %v40_v28 }
   0xa   :  { %1151 = vrsqrt.f32 %v41_v29  ;;  %vm63_vm2 = vcmp.eq.f32.partialorder %v41_v29, inf  ;;  %vm65_vm3 = vcmp.eq.f32.partialorder %v41_v29, 0.0  ;;  %v66_v56 = vand.u32 2147483648, %v41_v29 }
   0xb   :  { %1153 = vrsqrt.f32 %v42_v30  ;;  %vm75_vm4 = vcmp.eq.f32.partialorder %v42_v30, inf  ;;  %vm77_vm5 = vcmp.eq.f32.partialorder %v42_v30, 0.0  ;;  %v78_v59 = vand.u32 2147483648, %v42_v30 }
   0xc   :  { %1155 = vrsqrt.f32 %v43_v31  ;;  %vm87_vm6 = vcmp.eq.f32.partialorder %v43_v31, inf  ;;  %v90_v63 = vand.u32 2147483648, %v43_v31  ;;  %vm89_vm7 = vcmp.eq.f32.partialorder %v43_v31, 0.0 }
   0xf   :  { %v1150_v32 = vpop.eup %1149 }
  0x10   :  { %v1152_v33 = vpop.eup %1151  ;;  %v45_v34 = vmul.f32 %v1150_v32, %v40_v28 }
  0x11   :  { %v1154_v35 = vpop.eup %1153  ;;  %v57_v36 = vmul.f32 %v1152_v33, %v41_v29 }
  0x12   :  { %v1156_v37 = vpop.eup %1155  ;;  %v46_v38 = vmul.f32 %v1150_v32, %v45_v34  ;;  %v69_v39 = vmul.f32 %v1154_v35, %v42_v30 }
  0x13   :  { %v58_v40 = vmul.f32 %v1152_v33, %v57_v36  ;;  %v81_v41 = vmul.f32 %v1156_v37, %v43_v31 }
  0x14   :  { %v47_v42 = vmul.f32 0.5, %v46_v38  ;;  %v70_v43 = vmul.f32 %v1154_v35, %v69_v39 }
  0x15   :  { %v59_v44 = vmul.f32 0.5, %v58_v40  ;;  %v82_v45 = vmul.f32 %v1156_v37, %v81_v41 }
  0x16   :  { %v48_v46 = vsub.f32 1.5, %v47_v42  ;;  %v71_v47 = vmul.f32 0.5, %v70_v43 }
  0x17   :  { %v60_v48 = vsub.f32 1.5, %v59_v44  ;;  %v83_v49 = vmul.f32 0.5, %v82_v45 }
  0x18   :  { %v49_v50 = vmul.f32 %v1150_v32, %v48_v46  ;;  %v72_v52 = vsub.f32 1.5, %v71_v47 }
  0x19   :  { %v61_v53 = vmul.f32 %v1152_v33, %v60_v48  ;;  %v84_v54 = vsub.f32 1.5, %v83_v49 }
  0x1a   :  { %v50_v55 = vmul.f32 %v49_v50, %v40_v28  ;;  %v73_v57 = vmul.f32 %v1154_v35, %v72_v52 }
  0x1b   :  { %v62_v58 = vmul.f32 %v61_v53, %v41_v29  ;;  %v85_v60 = vmul.f32 %v1156_v37, %v84_v54 }
  0x1c   :  { %v52_v61 = vsel %vm51_vm0, %v40_v28, %v50_v55  ;;  %v74_v62 = vmul.f32 %v73_v57, %v42_v30 }
  0x1d   :  { %v55_v6 = vsel %vm53_vm1, %v54_v51, %v52_v61  ;;  %v64_v7 = vsel %vm63_vm2, %v41_v29, %v62_v58  ;;  %v86_v8 = vmul.f32 %v85_v60, %v43_v31 }
  0x1e   :  { %v67_v12 = vsel %vm65_vm3, %v66_v56, %v64_v7  ;;  %v76_v13 = vsel %vm75_vm4, %v42_v30, %v74_v62 }
  0x1f   :  { %v79_v14 = vsel %vm77_vm5, %v78_v59, %v76_v13  ;;  %v88_v18 = vsel %vm87_vm6, %v43_v31, %v86_v8  ;;  %v92_v19 = vmax.f32 %v55_v6, %v67_v12 }
  0x20   :  { %v91_v20 = vsel %vm89_vm7, %v90_v63, %v88_v18 }
  0x21   :  { %v93_v21 = vmax.f32 %v79_v14, %v91_v20 }
  0x23   :  { %v94_v22 = vmax.f32 %v92_v19, %v93_v21 }
  0x25   :  { %v95_v23 = vrot.slane %v94_v22, 4 }
  0x27   :  { %v96_v24 = vmax.f32 %v94_v22, %v95_v23 }
  0x29   :  { %v97_v25 = vrot.slane %v96_v24, 2 }
  0x2b   :  { %v98_v26 = vmax.f32 %v96_v24, %v97_v25 }
  0x2d   :  { %v99_v27 = vrot.slane %v98_v26, 1 }
  0x2f   :  { %v100_v28 = vmax.f32 %v98_v26, %v99_v27 }
  0x31   :  { %v101_v32 = vsub.f32 %v100_v28, %v55_v6  ;;  %v102_v33 = vsub.f32 %v100_v28, %v67_v12  ;;  %v103_v34 = vsub.f32 %v100_v28, %v79_v14  ;;  %v104_v35 = vsub.f32 %v100_v28, %v91_v20 }
  0x33   :  { %v105_v36 = vadd.f32 %v102_v33, %v101_v32 }
  0x35   :  { %v106_v29 = vadd.f32 %v105_v36, %v103_v34 }
  0x37   :  { %v107_v37 = vadd.f32 %v106_v29, %v104_v35 }
  0x39   :  { %v108_v30 = vrot.slane %v107_v37, 4 }
  0x3b   :  { %v109_v38 = vadd.f32 %v108_v30, %v107_v37 }
  0x3d   :  { %v110_v31 = vrot.slane %v109_v38, 2 }
  0x3f   :  { %v111_v39 = vadd.f32 %v110_v31, %v109_v38 }
  0x41   :  { %v112_v40 = vrot.slane %v111_v39, 1 }
  0x43   :  { %v113_v41 = vadd.f32 %v112_v40, %v111_v39 }
  0x45   :  { %v114_v42 = vadd.f32 1e-06, %v113_v41 }
  0x47   :  { %1157 = vrcp.f32 %v114_v42 }
  0x4d   :  { %v1158_v43 = vpop.eup %1157 }
  0x4e   :  { %v116_v44 = vmul.f32 %v1158_v43, %v101_v32  ;;  %v117_v45 = vmul.f32 %v1158_v43, %v102_v33  ;;  %v118_v46 = vmul.f32 %v1158_v43, %v103_v34  ;;  %v119_v47 = vmul.f32 %v1158_v43, %v104_v35 }
  0x50   :  { %v120_v48 = vmul.f32 %v116_v44, %v1238_v0  ;;  %v121_v49 = vmul.f32 %v117_v45, %v1243_v1  ;;  %v122_v50 = vmul.f32 %v118_v46, %v1248_v2  ;;  %v123_v51 = vmul.f32 %v119_v47, %v1253_v3 }
  0x51   :  { %v124_v52 = vmul.f32 %v1258_v4, %v116_v44  ;;  %v125_v53 = vmul.f32 %v1263_v5, %v117_v45  ;;  %v126_v54 = vmul.f32 %v1274_v9, %v118_v46  ;;  %v127_v55 = vmul.f32 %v1279_v10, %v119_v47 }
  0x52   :  { %v132_v56 = vmul.f32 %v120_v48, %v1238_v0  ;;  %v133_v57 = vmul.f32 %v121_v49, %v1243_v1  ;;  %v134_v58 = vmul.f32 %v122_v50, %v1248_v2  ;;  %v135_v59 = vmul.f32 %v123_v51, %v1253_v3 }
  0x53   :  { %v145_v60 = vmul.f32 %v1258_v4, %v120_v48  ;;  %v146_v61 = vmul.f32 %v1263_v5, %v121_v49  ;;  %v147_v62 = vmul.f32 %v1274_v9, %v122_v50  ;;  %v148_v63 = vmul.f32 %v1279_v10, %v123_v51 }
  0x54   :  { %v136_v6 = vadd.f32 %v133_v57, %v132_v56  ;;  %v171_v7 = vmul.f32 %v1258_v4, %v124_v52  ;;  %v172_v8 = vmul.f32 %v1263_v5, %v125_v53  ;;  %v173_v0 = vmul.f32 %v1274_v9, %v126_v54 }
  0x55   :  { %v149_v1 = vadd.f32 %v146_v61, %v145_v60  ;;  %v174_v2 = vmul.f32 %v1279_v10, %v127_v55  ;;  %v128_v3 = vmul.f32 %v1284_v11, %v116_v44  ;;  %v129_v12 = vmul.f32 %v1295_v15, %v117_v45 }
  0x56   :  { %v137_v13 = vadd.f32 %v136_v6, %v134_v58  ;;  %v175_v14 = vadd.f32 %v172_v8, %v171_v7  ;;  %v130_v18 = vmul.f32 %v1300_v16, %v118_v46  ;;  %v131_v19 = vmul.f32 %v1305_v17, %v119_v47 }
  0x57   :  { %v150_v20 = vadd.f32 %v149_v1, %v147_v62  ;;  %v197_v4 = vmul.f32 %v1284_v11, %v128_v3  ;;  %v198_v5 = vmul.f32 %v1295_v15, %v129_v12  ;;  %v158_v9 = vmul.f32 %v1284_v11, %v120_v48 }
  0x58   :  { %v138_v21 = vadd.f32 %v137_v13, %v135_v59  ;;  %v176_v22 = vadd.f32 %v175_v14, %v173_v0  ;;  %v199_v10 = vmul.f32 %v1300_v16, %v130_v18  ;;  %v200_v23 = vmul.f32 %v1305_v17, %v131_v19 }
  0x59   :  { %v151_v24 = vadd.f32 %v150_v20, %v148_v63  ;;  %v201_v25 = vadd.f32 %v198_v5, %v197_v4  ;;  %v159_v26 = vmul.f32 %v1295_v15, %v121_v49  ;;  %v160_v27 = vmul.f32 %v1300_v16, %v122_v50 }
  0x5a   :  { %v139_v28 = vrot.slane %v138_v21, 4  ;;  %v177_v32 = vadd.f32 %v176_v22, %v174_v2  ;;  %v161_v33 = vmul.f32 %v1305_v17, %v123_v51  ;;  %v184_v34 = vmul.f32 %v1284_v11, %v124_v52 }
  0x5b   :  { %v152_v35 = vrot.slane %v151_v24, 4  ;;  %v202_v36 = vadd.f32 %v201_v25, %v199_v10  ;;  %v162_v29 = vadd.f32 %v159_v26, %v158_v9  ;;  %v185_v37 = vmul.f32 %v1295_v15, %v125_v53 }
  0x5c   :  { %v140_v30 = vadd.f32 %v139_v28, %v138_v21  ;;  %v178_v38 = vrot.slane %v177_v32, 4  ;;  %v186_v31 = vmul.f32 %v1300_v16, %v126_v54  ;;  %v187_v39 = vmul.f32 %v1305_v17, %v127_v55 }
  0x5d   :  { %v153_v40 = vadd.f32 %v152_v35, %v151_v24  ;;  %v203_v41 = vadd.f32 %v202_v36, %v200_v23  ;;  %v163_v42 = vadd.f32 %v162_v29, %v160_v27  ;;  %v188_v43 = vadd.f32 %v185_v37, %v184_v34 }
  0x5e   :  { %v141_v44 = vrot.slane %v140_v30, 2  ;;  %v179_v45 = vadd.f32 %v178_v38, %v177_v32 }
  0x5f   :  { %v154_v46 = vrot.slane %v153_v40, 2  ;;  %v204_v47 = vrot.slane %v203_v41, 4  ;;  %v164_v11 = vadd.f32 %v163_v42, %v161_v33  ;;  %v189_v48 = vadd.f32 %v188_v43, %v186_v31 }
  0x60   :  { %v142_v49 = vadd.f32 %v141_v44, %v140_v30  ;;  %v180_v50 = vrot.slane %v179_v45, 2  ;;  %v1217_v30 = vmov -1.0  }
  0x61   :  { %v155_v51 = vadd.f32 %v154_v46, %v153_v40  ;;  %v205_v15 = vadd.f32 %v204_v47, %v203_v41  ;;  %v165_v52 = vrot.slane %v164_v11, 4  ;;  %v190_v53 = vadd.f32 %v189_v48, %v187_v39 }
  0x62   :  { %v143_v56 = vrot.slane %v142_v49, 1  ;;  %v181_v16 = vadd.f32 %v180_v50, %v179_v45 }
  0x63   :  { %v156_v54 = vrot.slane %v155_v51, 1  ;;  %v206_v17 = vrot.slane %v205_v15, 2  ;;  %v166_v55 = vadd.f32 %v165_v52, %v164_v11  ;;  %v191_v57 = vrot.slane %v190_v53, 4 }
  0x64   :  { %v144_v58 = vadd.f32 %v143_v56, %v142_v49  ;;  %v182_v59 = vrot.slane %v181_v16, 1 }
  0x65   :  { %v157_v60 = vadd.f32 %v156_v54, %v155_v51  ;;  %v207_v61 = vadd.f32 %v206_v17, %v205_v15  ;;  %v167_v62 = vrot.slane %v166_v55, 2  ;;  %v192_v63 = vadd.f32 %v191_v57, %v190_v53 }
  0x66   :  { %210 = vst [vmem:[#allocation2 + $0x30] sm:$0x1] %v144_v58  ;;  %v183_v6 = vadd.f32 %v182_v59, %v181_v16 }
  0x67   :  { %211 = vst [vmem:[#allocation2] sm:$0x1] %v157_v60  ;;  %v208_v7 = vrot.slane %v207_v61, 1  ;;  %v168_v8 = vadd.f32 %v167_v62, %v166_v55  ;;  %v193_v0 = vrot.slane %v192_v63, 2 }
  0x68   :  { %213 = vst [vmem:[#allocation2 + $0x18] sm:$0x1] %v183_v6 }
  0x69   :  { %v209_v1 = vadd.f32 %v208_v7, %v207_v61  ;;  %v169_v2 = vrot.slane %v168_v8, 1  ;;  %v194_v3 = vadd.f32 %v193_v0, %v192_v63 }
  0x6b   :  { %215 = vst [vmem:[#allocation2 + $0x20] sm:$0x1] %v209_v1  ;;  %v170_v12 = vadd.f32 %v169_v2, %v168_v8  ;;  %v195_v13 = vrot.slane %v194_v3, 1 }
  0x6d   :  { %212 = vst [vmem:[#allocation2 + $0x58] sm:$0x1] %v170_v12  ;;  %v196_v14 = vadd.f32 %v195_v13, %v194_v3  ;;  %v216_v18 = vld [vmem:[#allocation2 + $0x30] sm:$0x1] }
  0x6e   :  { %v217_v19 = vld [vmem:[#allocation2] sm:$0x1] }
  0x6f   :  { %v227_v20 = vmul.f32 4.0, %v217_v19  ;;  %214 = vst [vmem:[#allocation2 + $0x40] sm:$0x1] %v196_v14  ;;  %v219_v4 = vld [vmem:[#allocation2 + $0x18] sm:$0x1]  ;;  %v246_v31 = vmul.f32 2.0, %v217_v19 }
  0x70   :  { %v222_v5 = vsub.f32 %v219_v4, %v216_v18  ;;  %v223_v32 = vand.u32 2147483647, %v217_v19 }
  0x71   :  { %v228_v9 = vmul.f32 %v227_v20, %v217_v19 }
  0x72   :  { %v226_v21 = vmul.f32 %v222_v5, %v222_v5  ;;  %v225_v34 = vand.u32 2147483647, %v222_v5  ;;  %vm224_vm10 = vcmp.lt.f32.partialorder %v223_v32, 1e-37  ;;  %vm244_vm11 = vcmp.ge.f32.partialorder %v222_v5, 0.0 }
  0x73   :  { %v245_v38 = vsel %vm244_vm11, 1.0, %v1217_v30  ;;  %v221_v16 = vld [vmem:[#allocation2 + $0x20] sm:$0x1] }
  0x74   :  { %v229_v22 = vadd.f32 %v228_v9, %v226_v21  ;;  %v247_v39 = vmul.f32 %v246_v31, %v245_v38  ;;  %v218_v53 = vld [vmem:[#allocation2 + $0x58] sm:$0x1] }
  0x76   :  { %1159 = vrsqrt.f32 %v229_v22  ;;  %vm237_vm8 = vcmp.eq.f32.partialorder %v229_v22, inf  ;;  %v240_v33 = vand.u32 2147483648, %v229_v22  ;;  %vm239_vm9 = vcmp.eq.f32.partialorder %v229_v22, 0.0  ;;  %v220_v15 = vld [vmem:[#allocation2 + $0x40] sm:$0x1] }
  0x7c   :  { %v1160_v10 = vpop.eup %1159 }
  0x7d   :  { %v231_v23 = vmul.f32 %v1160_v10, %v229_v22 }
  0x7f   :  { %v232_v24 = vmul.f32 %v1160_v10, %v231_v23 }
  0x81   :  { %v233_v25 = vmul.f32 0.5, %v232_v24 }
  0x83   :  { %v234_v26 = vsub.f32 1.5, %v233_v25 }
  0x85   :  { %v235_v27 = vmul.f32 %v1160_v10, %v234_v26 }
  0x87   :  { %v236_v28 = vmul.f32 %v235_v27, %v229_v22 }
  0x89   :  { %v238_v35 = vsel %vm237_vm8, %v229_v22, %v236_v28 }
  0x8a   :  { %v241_v36 = vsel %vm239_vm9, %v240_v33, %v238_v35 }
  0x8b   :  { %v242_v29 = vadd.f32 %v241_v36, %v225_v34 }
  0x8d   :  { %v243_v37 = vsel %vm224_vm10, 1.0, %v242_v29 }
  0x8e   :  { %1161 = vrcp.f32 %v243_v37 }
  0x94   :  { %v1162_v40 = vpop.eup %1161 }
  0x95   :  { %v249_v41 = vmul.f32 %v1162_v40, %v247_v39 }
  0x97   :  { %v250_v42 = vsel %vm224_vm10, 0.0, %v249_v41 }
  0x98   :  { %v251_v43 = vmul.f32 %v250_v42, %v250_v42  ;;  %v264_v44 = vmul.f32 %v250_v42, %v217_v19 }
  0x9a   :  { %v252_v45 = vadd.f32 1.0, %v251_v43  ;;  %v1360_v46 = vsub.f32 %v216_v18, %v264_v44  ;;  %v1362_v47 = vadd.f32 %v264_v44, %v219_v4 }
  0x9c   :  { %1163 = vrsqrt.f32 %v252_v45  ;;  %vm259_vm13 = vweird.f32 %v252_v45  ;;  %v281_v63 = vsub.f32 %v221_v16, %v1360_v46 }
  0x9e   :  { %v285_v12 = vmul.f32 %v281_v63, %v281_v63  ;;  %v284_v23 = vand.u32 2147483647, %v281_v63  ;;  %vm303_vm2 = vcmp.ge.f32.partialorder %v281_v63, 0.0 }
  0x9f   :  { %v304_v32 = vsel %vm303_vm2, 1.0, %v1217_v30 }
  0xa2   :  { %v1164_v11 = vpop.eup %1163 }
  0xa3   :  { %v254_v48 = vmul.f32 %v1164_v11, %v252_v45  ;;  %vm260_vm12 = vweird.f32 %v1164_v11 }
  0xa4   :  { %vm261_vm14 = vmor %vm259_vm13, %vm260_vm12 }
  0xa5   :  { %v255_v49 = vmul.f32 %v1164_v11, %v254_v48 }
  0xa7   :  { %v256_v50 = vmul.f32 0.5, %v255_v49 }
  0xa9   :  { %v257_v51 = vsub.f32 1.5, %v256_v50 }
  0xab   :  { %v258_v52 = vmul.f32 %v1164_v11, %v257_v51 }
  0xad   :  { %v262_v56 = vsel %vm261_vm14, %v1164_v11, %v258_v52 }
  0xae   :  { %v263_v54 = vmul.f32 %v262_v56, %v250_v42  ;;  %v271_v17 = vmul.f32 %v262_v56, %v220_v15  ;;  %v275_v55 = vmul.f32 0.0, %v262_v56  ;;  %v267_v57 = vmul.f32 %v262_v56, %v218_v53 }
  0xb0   :  { %v268_v58 = vmul.f32 %v263_v54, %v220_v15  ;;  %v270_v59 = vmul.f32 %v263_v54, %v218_v53  ;;  %v273_v60 = vmul.f32 0.0, %v263_v54  ;;  %v1364_v61 = vadd.f32 %v275_v55, %v263_v54 }
  0xb1   :  { %v277_v62 = vsub.f32 %v275_v55, %v263_v54 }
  0xb2   :  { %v269_v6 = vsub.f32 %v267_v57, %v268_v58  ;;  %v272_v7 = vadd.f32 %v271_v17, %v270_v59  ;;  %v274_v8 = vsub.f32 %v262_v56, %v273_v60  ;;  %v1367_v0 = vadd.f32 %v273_v60, %v262_v56 }
  0xb3   :  { %v279_v1 = vsub.f32 %v275_v55, %v273_v60  ;;  %v1369_v2 = vadd.f32 %v275_v55, %v273_v60 }
  0xb4   :  { %v286_v3 = vmul.f32 4.0, %v269_v6  ;;  %v282_v22 = vand.u32 2147483647, %v269_v6  ;;  %v305_v28 = vmul.f32 2.0, %v269_v6 }
  0xb6   :  { %v287_v13 = vmul.f32 %v286_v3, %v269_v6  ;;  %vm283_vm1 = vcmp.lt.f32.partialorder %v282_v22, 1e-37  ;;  %v306_v33 = vmul.f32 %v305_v28, %v304_v32 }
  0xb8   :  { %v288_v14 = vadd.f32 %v287_v13, %v285_v12 }
  0xba   :  { %1165 = vrsqrt.f32 %v288_v14  ;;  %vm296_vm15 = vcmp.eq.f32.partialorder %v288_v14, inf  ;;  %v299_v10 = vand.u32 2147483648, %v288_v14  ;;  %vm298_vm0 = vcmp.eq.f32.partialorder %v288_v14, 0.0 }
  0xc0   :  { %v1166_v18 = vpop.eup %1165 }
  0xc1   :  { %v290_v19 = vmul.f32 %v1166_v18, %v288_v14 }
  0xc3   :  { %v291_v20 = vmul.f32 %v1166_v18, %v290_v19 }
  0xc5   :  { %v292_v4 = vmul.f32 0.5, %v291_v20 }
  0xc7   :  { %v293_v5 = vsub.f32 1.5, %v292_v4 }
  0xc9   :  { %v294_v9 = vmul.f32 %v1166_v18, %v293_v5 }
  0xcb   :  { %v295_v21 = vmul.f32 %v294_v9, %v288_v14 }
  0xcd   :  { %v297_v24 = vsel %vm296_vm15, %v288_v14, %v295_v21 }
  0xce   :  { %v300_v25 = vsel %vm298_vm0, %v299_v10, %v297_v24 }
  0xcf   :  { %v301_v26 = vadd.f32 %v300_v25, %v284_v23 }
  0xd1   :  { %v302_v27 = vsel %vm283_vm1, 1.0, %v301_v26 }
  0xd2   :  { %1167 = vrcp.f32 %v302_v27 }
  0xd8   :  { %v1168_v34 = vpop.eup %1167 }
  0xd9   :  { %v308_v35 = vmul.f32 %v1168_v34, %v306_v33 }
  0xdb   :  { %v309_v36 = vsel %vm283_vm1, 0.0, %v308_v35 }
  0xdc   :  { %v310_v29 = vmul.f32 %v309_v36, %v309_v36  ;;  %v1372_v42 = vmul.f32 %v309_v36, %v269_v6 }
  0xde   :  { %v311_v37 = vadd.f32 1.0, %v310_v29  ;;  %v1375_v45 = vadd.f32 %v1372_v42, %v221_v16 }
  0xe0   :  { %1169 = vrsqrt.f32 %v311_v37  ;;  %vm318_vm4 = vweird.f32 %v311_v37  ;;  %v344_v57 = vsub.f32 %v1375_v45, %v1362_v47 }
  0xe2   :  { %v347_v21 = vand.u32 2147483647, %v344_v57  ;;  %vm366_vm9 = vcmp.ge.f32.partialorder %v344_v57, 0.0 }
  0xe3   :  { %v367_v26 = vsel %vm366_vm9, 1.0, %v1217_v30 }
  0xe6   :  { %v1170_v38 = vpop.eup %1169 }
  0xe7   :  { %v313_v31 = vmul.f32 %v1170_v38, %v311_v37  ;;  %vm319_vm3 = vweird.f32 %v1170_v38 }
  0xe8   :  { %vm320_vm5 = vmor %vm318_vm4, %vm319_vm3 }
  0xe9   :  { %v314_v39 = vmul.f32 %v1170_v38, %v313_v31 }
  0xeb   :  { %v315_v40 = vmul.f32 0.5, %v314_v39 }
  0xed   :  { %v316_v41 = vsub.f32 1.5, %v315_v40 }
  0xef   :  { %v317_v43 = vmul.f32 %v1170_v38, %v316_v41  ;;  %v1398_v41 = vsub.f32 %v1360_v46, %v1372_v42 }
  0xf1   :  { %v321_v44 = vsel %vm320_vm5, %v1170_v38, %v317_v43 }
  0xf2   :  { %v322_v11 = vmul.f32 %v321_v44, %v309_v36  ;;  %v332_v48 = vmul.f32 %v321_v44, %v274_v8  ;;  %v326_v49 = vmul.f32 0.0, %v321_v44  ;;  %v330_v50 = vmul.f32 %v321_v44, %v272_v7 }
  0xf3   :  { %v336_v51 = vmul.f32 %v321_v44, %v277_v62  ;;  %v340_v15 = vmul.f32 %v321_v44, %v279_v1 }
  0xf4   :  { %v327_v52 = vmul.f32 %v322_v11, %v272_v7  ;;  %v329_v53 = vmul.f32 0.0, %v322_v11  ;;  %v334_v56 = vmul.f32 %v322_v11, %v274_v8  ;;  %v338_v54 = vmul.f32 %v322_v11, %v277_v62 }
  0xf5   :  { %v1377_v17 = vsub.f32 %v340_v15, %v322_v11  ;;  %v342_v55 = vmul.f32 %v322_v11, %v279_v1  ;;  %v348_v8 = vmul.f32 %v344_v57, %v344_v57 }
  0xf6   :  { %v1381_v58 = vsub.f32 %v326_v49, %v327_v52  ;;  %v331_v16 = vadd.f32 %v330_v50, %v329_v53  ;;  %v1383_v59 = vsub.f32 %v332_v48, %v329_v53  ;;  %v335_v60 = vadd.f32 %v334_v56, %v326_v49 }
  0xf7   :  { %v1385_v63 = vsub.f32 %v336_v51, %v329_v53  ;;  %v339_v6 = vadd.f32 %v338_v54, %v326_v49  ;;  %v1387_v3 = vadd.f32 %v342_v55, %v321_v44 }
  0xf8   :  { %v349_v7 = vmul.f32 4.0, %v331_v16  ;;  %v345_v5 = vand.u32 2147483647, %v331_v16  ;;  %v368_v25 = vmul.f32 2.0, %v331_v16 }
  0xfa   :  { %v350_v62 = vmul.f32 %v349_v7, %v331_v16  ;;  %vm346_vm8 = vcmp.lt.f32.partialorder %v345_v5, 1e-37  ;;  %v369_v27 = vmul.f32 %v368_v25, %v367_v26 }
  0xfc   :  { %v351_v12 = vadd.f32 %v350_v62, %v348_v8 }
  0xfe   :  { %1171 = vrsqrt.f32 %v351_v12  ;;  %vm359_vm6 = vcmp.eq.f32.partialorder %v351_v12, inf  ;;  %v362_v9 = vand.u32 2147483648, %v351_v12  ;;  %vm361_vm7 = vcmp.eq.f32.partialorder %v351_v12, 0.0 }
 0x104   :  { %v1172_v1 = vpop.eup %1171 }
 0x105   :  { %v353_v13 = vmul.f32 %v1172_v1, %v351_v12 }
 0x107   :  { %v354_v14 = vmul.f32 %v1172_v1, %v353_v13 }
 0x109   :  { %v355_v18 = vmul.f32 0.5, %v354_v14 }
 0x10b   :  { %v356_v19 = vsub.f32 1.5, %v355_v18 }
 0x10d   :  { %v357_v20 = vmul.f32 %v1172_v1, %v356_v19 }
 0x10f   :  { %v358_v4 = vmul.f32 %v357_v20, %v351_v12 }
 0x111   :  { %v360_v22 = vsel %vm359_vm6, %v351_v12, %v358_v4 }
 0x112   :  { %v363_v10 = vsel %vm361_vm7, %v362_v9, %v360_v22 }
 0x113   :  { %v364_v23 = vadd.f32 %v363_v10, %v347_v21 }
 0x115   :  { %v365_v24 = vsel %vm346_vm8, 1.0, %v364_v23 }
 0x116   :  { %1173 = vrcp.f32 %v365_v24 }
 0x11c   :  { %v1174_v28 = vpop.eup %1173 }
 0x11d   :  { %v371_v32 = vmul.f32 %v1174_v28, %v369_v27 }
 0x11f   :  { %v372_v33 = vsel %vm346_vm8, 0.0, %v371_v32 }
 0x120   :  { %v373_v34 = vmul.f32 %v372_v33, %v372_v33  ;;  %v1390_v35 = vmul.f32 %v372_v33, %v331_v16 }
 0x122   :  { %v374_v36 = vadd.f32 1.0, %v373_v34  ;;  %v1394_v40 = vsub.f32 %v1362_v47, %v1390_v35 }
 0x124   :  { %1175 = vrsqrt.f32 %v374_v36  ;;  %vm381_vm11 = vweird.f32 %v374_v36  ;;  %v413_v11 = vsub.f32 %v1394_v40, %v1398_v41 }
 0x126   :  { %v417_v14 = vmul.f32 %v413_v11, %v413_v11  ;;  %v416_v24 = vand.u32 2147483647, %v413_v11  ;;  %vm435_vm0 = vcmp.ge.f32.partialorder %v413_v11, 0.0 }
 0x127   :  { %v436_v32 = vsel %vm435_vm0, 1.0, %v1217_v30 }
 0x12a   :  { %v1176_v29 = vpop.eup %1175 }
 0x12b   :  { %v376_v37 = vmul.f32 %v1176_v29, %v374_v36  ;;  %vm382_vm10 = vweird.f32 %v1176_v29 }
 0x12c   :  { %vm383_vm12 = vmor %vm381_vm11, %vm382_vm10 }
 0x12d   :  { %v377_v38 = vmul.f32 %v1176_v29, %v376_v37 }
 0x12f   :  { %v378_v31 = vmul.f32 0.5, %v377_v38 }
 0x131   :  { %v379_v39 = vsub.f32 1.5, %v378_v31 }
 0x133   :  { %v380_v43 = vmul.f32 %v1176_v29, %v379_v39 }
 0x135   :  { %v384_v44 = vsel %vm383_vm12, %v1176_v29, %v380_v43 }
 0x136   :  { %v385_v48 = vmul.f32 %v384_v44, %v372_v33  ;;  %v389_v49 = vmul.f32 %v384_v44, %v1381_v58  ;;  %v393_v50 = vmul.f32 0.0, %v384_v44  ;;  %v395_v51 = vmul.f32 %v384_v44, %v1364_v61 }
 0x137   :  { %v399_v15 = vmul.f32 %v384_v44, %v335_v60  ;;  %v401_v47 = vmul.f32 %v384_v44, %v1367_v0  ;;  %v405_v52 = vmul.f32 %v384_v44, %v339_v6  ;;  %v407_v46 = vmul.f32 %v384_v44, %v1369_v2 }
 0x138   :  { %v390_v42 = vmul.f32 0.0, %v385_v48  ;;  %v392_v53 = vmul.f32 %v385_v48, %v1381_v58  ;;  %v396_v56 = vmul.f32 %v385_v48, %v335_v60  ;;  %v398_v54 = vmul.f32 %v385_v48, %v1364_v61 }
 0x139   :  { %v402_v55 = vmul.f32 %v385_v48, %v339_v6  ;;  %v404_v57 = vmul.f32 %v385_v48, %v1367_v0  ;;  %v408_v16 = vmul.f32 %v385_v48, %v1387_v3  ;;  %v410_v7 = vmul.f32 %v385_v48, %v1369_v2 }
 0x13a   :  { %v391_v8 = vsub.f32 %v389_v49, %v390_v42  ;;  %v1411_v62 = vadd.f32 %v393_v50, %v392_v53  ;;  %v1413_v12 = vsub.f32 %v395_v51, %v396_v56  ;;  %v1415_v1 = vadd.f32 %v399_v15, %v398_v54 }
 0x13b   :  { %v1417_v13 = vsub.f32 %v401_v47, %v402_v55  ;;  %v1419_v58 = vadd.f32 %v405_v52, %v404_v57  ;;  %v1421_v60 = vsub.f32 %v407_v46, %v408_v16  ;;  %v411_v61 = vmul.f32 %v384_v44, %v1387_v3 }
 0x13c   :  { %v418_v0 = vmul.f32 4.0, %v391_v8  ;;  %v414_v10 = vand.u32 2147483647, %v391_v8  ;;  %v437_v28 = vmul.f32 2.0, %v391_v8  ;;  %v1435_v50 = vadd.f32 %v1390_v35, %v1375_v45 }
 0x13d   :  { %v1424_v6 = vadd.f32 %v411_v61, %v410_v7 }
 0x13e   :  { %v419_v2 = vmul.f32 %v418_v0, %v391_v8  ;;  %vm415_vm15 = vcmp.lt.f32.partialorder %v414_v10, 1e-37  ;;  %v438_v33 = vmul.f32 %v437_v28, %v436_v32 }
 0x140   :  { %v420_v18 = vadd.f32 %v419_v2, %v417_v14 }
 0x142   :  { %1177 = vrsqrt.f32 %v420_v18  ;;  %vm428_vm13 = vcmp.eq.f32.partialorder %v420_v18, inf  ;;  %v431_v23 = vand.u32 2147483648, %v420_v18  ;;  %vm430_vm14 = vcmp.eq.f32.partialorder %v420_v18, 0.0 }
 0x148   :  { %v1178_v19 = vpop.eup %1177 }
 0x149   :  { %v422_v20 = vmul.f32 %v1178_v19, %v420_v18 }
 0x14b   :  { %v423_v4 = vmul.f32 %v1178_v19, %v422_v20 }
 0x14d   :  { %v424_v5 = vmul.f32 0.5, %v423_v4 }
 0x14f   :  { %v425_v9 = vsub.f32 1.5, %v424_v5 }
 0x151   :  { %v426_v21 = vmul.f32 %v1178_v19, %v425_v9 }
 0x153   :  { %v427_v22 = vmul.f32 %v426_v21, %v420_v18 }
 0x155   :  { %v429_v25 = vsel %vm428_vm13, %v420_v18, %v427_v22 }
 0x156   :  { %v432_v3 = vsel %vm430_vm14, %v431_v23, %v429_v25 }
 0x157   :  { %v433_v26 = vadd.f32 %v432_v3, %v416_v24 }
 0x159   :  { %v434_v27 = vsel %vm415_vm15, 1.0, %v433_v26 }
 0x15a   :  { %1179 = vrcp.f32 %v434_v27 }
 0x160   :  { %v1180_v34 = vpop.eup %1179 }
 0x161   :  { %v440_v36 = vmul.f32 %v1180_v34, %v438_v33 }
 0x163   :  { %v441_v29 = vsel %vm415_vm15, 0.0, %v440_v36 }
 0x164   :  { %v442_v37 = vmul.f32 %v441_v29, %v441_v29  ;;  %v1427_v44 = vmul.f32 %v441_v29, %v391_v8 }
 0x166   :  { %v443_v38 = vadd.f32 1.0, %v442_v37  ;;  %v1431_v11 = vsub.f32 %v1398_v41, %v1427_v44 }
 0x168   :  { %1181 = vrsqrt.f32 %v443_v38  ;;  %vm450_vm2 = vweird.f32 %v443_v38  ;;  %v482_v47 = vsub.f32 %v1435_v50, %v1431_v11 }
 0x16a   :  { %v486_v4 = vmul.f32 %v482_v47, %v482_v47  ;;  %v485_v27 = vand.u32 2147483647, %v482_v47  ;;  %vm504_vm7 = vcmp.ge.f32.partialorder %v482_v47, 0.0 }
 0x16b   :  { %v505_v36 = vsel %vm504_vm7, 1.0, %v1217_v30 }
 0x16e   :  { %v1182_v31 = vpop.eup %1181 }
 0x16f   :  { %v445_v39 = vmul.f32 %v1182_v31, %v443_v38  ;;  %vm451_vm1 = vweird.f32 %v1182_v31 }
 0x170   :  { %vm452_vm3 = vmor %vm450_vm2, %vm451_vm1 }
 0x171   :  { %v446_v43 = vmul.f32 %v1182_v31, %v445_v39 }
 0x173   :  { %v447_v48 = vmul.f32 0.5, %v446_v43 }
 0x175   :  { %v448_v49 = vsub.f32 1.5, %v447_v48 }
 0x177   :  { %v449_v51 = vmul.f32 %v1182_v31, %v448_v49 }
 0x179   :  { %v453_v15 = vsel %vm452_vm3, %v1182_v31, %v449_v51 }
 0x17a   :  { %v454_v52 = vmul.f32 %v453_v15, %v441_v29  ;;  %v458_v46 = vmul.f32 %v453_v15, %v1411_v62  ;;  %v462_v42 = vmul.f32 0.0, %v453_v15  ;;  %v464_v53 = vmul.f32 %v453_v15, %v1383_v59 }
 0x17b   :  { %v468_v41 = vmul.f32 %v453_v15, %v1413_v12  ;;  %v470_v56 = vmul.f32 %v453_v15, %v1385_v63  ;;  %v474_v45 = vmul.f32 %v453_v15, %v1417_v13  ;;  %v476_v35 = vmul.f32 %v453_v15, %v1377_v17 }
 0x17c   :  { %v459_v54 = vmul.f32 0.0, %v454_v52  ;;  %v461_v55 = vmul.f32 %v454_v52, %v1411_v62  ;;  %v465_v57 = vmul.f32 %v454_v52, %v1413_v12  ;;  %v467_v16 = vmul.f32 %v454_v52, %v1383_v59 }
 0x17d   :  { %v471_v7 = vmul.f32 %v454_v52, %v1417_v13  ;;  %v473_v8 = vmul.f32 %v454_v52, %v1385_v63  ;;  %v477_v61 = vmul.f32 %v454_v52, %v1421_v60  ;;  %v479_v0 = vmul.f32 %v454_v52, %v1377_v17 }
 0x17e   :  { %v460_v14 = vsub.f32 %v458_v46, %v459_v54  ;;  %v1452_v2 = vadd.f32 %v462_v42, %v461_v55  ;;  %v1454_v18 = vsub.f32 %v464_v53, %v465_v57  ;;  %v1456_v19 = vadd.f32 %v468_v41, %v467_v16 }
 0x17f   :  { %v1458_v62 = vsub.f32 %v470_v56, %v471_v7  ;;  %v1460_v12 = vadd.f32 %v474_v45, %v473_v8  ;;  %v1462_v59 = vsub.f32 %v476_v35, %v477_v61  ;;  %v480_v13 = vmul.f32 %v453_v15, %v1421_v60 }
 0x180   :  { %v487_v63 = vmul.f32 4.0, %v460_v14  ;;  %v483_v3 = vand.u32 2147483647, %v460_v14  ;;  %v506_v34 = vmul.f32 2.0, %v460_v14  ;;  %v1476_v42 = vadd.f32 %v1427_v44, %v1394_v40 }
 0x181   :  { %v1465_v20 = vadd.f32 %v480_v13, %v479_v0 }
 0x182   :  { %v488_v17 = vmul.f32 %v487_v63, %v460_v14  ;;  %vm484_vm6 = vcmp.lt.f32.partialorder %v483_v3, 1e-37  ;;  %v507_v29 = vmul.f32 %v506_v34, %v505_v36 }
 0x184   :  { %v489_v5 = vadd.f32 %v488_v17, %v486_v4 }
 0x186   :  { %1183 = vrsqrt.f32 %v489_v5  ;;  %vm497_vm4 = vcmp.eq.f32.partialorder %v489_v5, inf  ;;  %v500_v26 = vand.u32 2147483648, %v489_v5  ;;  %vm499_vm5 = vcmp.eq.f32.partialorder %v489_v5, 0.0 }
 0x18c   :  { %v1184_v9 = vpop.eup %1183 }
 0x18d   :  { %v491_v21 = vmul.f32 %v1184_v9, %v489_v5 }
 0x18f   :  { %v492_v22 = vmul.f32 %v1184_v9, %v491_v21 }
 0x191   :  { %v493_v10 = vmul.f32 0.5, %v492_v22 }
 0x193   :  { %v494_v23 = vsub.f32 1.5, %v493_v10 }
 0x195   :  { %v495_v24 = vmul.f32 %v1184_v9, %v494_v23 }
 0x197   :  { %v496_v25 = vmul.f32 %v495_v24, %v489_v5 }
 0x199   :  { %v498_v28 = vsel %vm497_vm4, %v489_v5, %v496_v25 }
 0x19a   :  { %v501_v60 = vsel %vm499_vm5, %v500_v26, %v498_v28 }
 0x19b   :  { %v502_v32 = vadd.f32 %v501_v60, %v485_v27 }
 0x19d   :  { %v503_v33 = vsel %vm484_vm6, 1.0, %v502_v32 }
 0x19e   :  { %1185 = vrcp.f32 %v503_v33 }
 0x1a4   :  { %v1186_v37 = vpop.eup %1185 }
 0x1a5   :  { %v509_v38 = vmul.f32 %v1186_v37, %v507_v29 }
 0x1a7   :  { %v510_v31 = vsel %vm484_vm6, 0.0, %v509_v38 }
 0x1a8   :  { %v511_v39 = vmul.f32 %v510_v31, %v510_v31  ;;  %v1468_v15 = vmul.f32 %v510_v31, %v460_v14 }
 0x1aa   :  { %v512_v43 = vadd.f32 1.0, %v511_v39  ;;  %v1472_v47 = vadd.f32 %v1468_v15, %v1435_v50 }
 0x1ac   :  { %1187 = vrsqrt.f32 %v512_v43  ;;  %vm519_vm9 = vweird.f32 %v512_v43  ;;  %v551_v56 = vsub.f32 %v1472_v47, %v1476_v42 }
 0x1ae   :  { %v555_v22 = vmul.f32 %v551_v56, %v551_v56  ;;  %v554_v33 = vand.u32 2147483647, %v551_v56  ;;  %vm573_vm14 = vcmp.ge.f32.partialorder %v551_v56, 0.0 }
 0x1af   :  { %v574_v38 = vsel %vm573_vm14, 1.0, %v1217_v30 }
 0x1b2   :  { %v1188_v48 = vpop.eup %1187 }
 0x1b3   :  { %v514_v49 = vmul.f32 %v1188_v48, %v512_v43  ;;  %vm520_vm8 = vweird.f32 %v1188_v48 }
 0x1b4   :  { %vm521_vm10 = vmor %vm519_vm9, %vm520_vm8 }
 0x1b5   :  { %v515_v51 = vmul.f32 %v1188_v48, %v514_v49 }
 0x1b7   :  { %v516_v52 = vmul.f32 0.5, %v515_v51 }
 0x1b9   :  { %v517_v46 = vsub.f32 1.5, %v516_v52 }
 0x1bb   :  { %v518_v53 = vmul.f32 %v1188_v48, %v517_v46 }
 0x1bd   :  { %v522_v41 = vsel %vm521_vm10, %v1188_v48, %v518_v53 }
 0x1be   :  { %v523_v45 = vmul.f32 %v522_v41, %v510_v31  ;;  %v527_v35 = vmul.f32 0.0, %v522_v41  ;;  %v531_v54 = vmul.f32 %v522_v41, %v1452_v2  ;;  %v533_v55 = vmul.f32 %v522_v41, %v1454_v18 }
 0x1bf   :  { %v537_v50 = vmul.f32 %v522_v41, %v1415_v1  ;;  %v539_v57 = vmul.f32 %v522_v41, %v1458_v62  ;;  %v543_v40 = vmul.f32 %v522_v41, %v1419_v58  ;;  %v545_v44 = vmul.f32 %v522_v41, %v1462_v59 }
 0x1c0   :  { %v528_v16 = vmul.f32 %v523_v45, %v1452_v2  ;;  %v530_v7 = vmul.f32 0.0, %v523_v45  ;;  %v534_v8 = vmul.f32 %v523_v45, %v1415_v1  ;;  %v536_v61 = vmul.f32 %v523_v45, %v1454_v18 }
 0x1c1   :  { %v540_v0 = vmul.f32 %v523_v45, %v1419_v58  ;;  %v542_v14 = vmul.f32 %v523_v45, %v1458_v62  ;;  %v546_v13 = vmul.f32 %v523_v45, %v1424_v6  ;;  %v548_v63 = vmul.f32 %v523_v45, %v1462_v59 }
 0x1c2   :  { %v1493_v4 = vsub.f32 %v527_v35, %v528_v16  ;;  %v532_v17 = vadd.f32 %v531_v54, %v530_v7  ;;  %v1495_v5 = vsub.f32 %v533_v55, %v534_v8  ;;  %v1497_v9 = vadd.f32 %v537_v50, %v536_v61 }
 0x1c3   :  { %v1499_v2 = vsub.f32 %v539_v57, %v540_v0  ;;  %v1501_v1 = vadd.f32 %v543_v40, %v542_v14  ;;  %v1503_v18 = vsub.f32 %v545_v44, %v546_v13  ;;  %v549_v58 = vmul.f32 %v522_v41, %v1424_v6 }
 0x1c4   :  { %v556_v62 = vmul.f32 4.0, %v532_v17  ;;  %v552_v60 = vand.u32 2147483647, %v532_v17  ;;  %v575_v37 = vmul.f32 2.0, %v532_v17  ;;  %v1517_v54 = vsub.f32 %v1431_v11, %v1468_v15 }
 0x1c5   :  { %v1506_v21 = vadd.f32 %v549_v58, %v548_v63 }
 0x1c6   :  { %v557_v59 = vmul.f32 %v556_v62, %v532_v17  ;;  %vm553_vm13 = vcmp.lt.f32.partialorder %v552_v60, 1e-37  ;;  %v576_v31 = vmul.f32 %v575_v37, %v574_v38 }
 0x1c8   :  { %v558_v10 = vadd.f32 %v557_v59, %v555_v22 }
 0x1ca   :  { %1189 = vrsqrt.f32 %v558_v10  ;;  %vm566_vm11 = vcmp.eq.f32.partialorder %v558_v10, inf  ;;  %v569_v32 = vand.u32 2147483648, %v558_v10  ;;  %vm568_vm12 = vcmp.eq.f32.partialorder %v558_v10, 0.0 }
 0x1d0   :  { %v1190_v23 = vpop.eup %1189 }
 0x1d1   :  { %v560_v24 = vmul.f32 %v1190_v23, %v558_v10 }
 0x1d3   :  { %v561_v25 = vmul.f32 %v1190_v23, %v560_v24 }
 0x1d5   :  { %v562_v3 = vmul.f32 0.5, %v561_v25 }
 0x1d7   :  { %v563_v26 = vsub.f32 1.5, %v562_v3 }
 0x1d9   :  { %v564_v27 = vmul.f32 %v1190_v23, %v563_v26 }
 0x1db   :  { %v565_v28 = vmul.f32 %v564_v27, %v558_v10 }
 0x1dd   :  { %v567_v34 = vsel %vm566_vm11, %v558_v10, %v565_v28 }
 0x1de   :  { %v570_v6 = vsel %vm568_vm12, %v569_v32, %v567_v34 }
 0x1df   :  { %v571_v36 = vadd.f32 %v570_v6, %v554_v33 }
 0x1e1   :  { %v572_v29 = vsel %vm553_vm13, 1.0, %v571_v36 }
 0x1e2   :  { %1191 = vrcp.f32 %v572_v29 }
 0x1e8   :  { %v1192_v39 = vpop.eup %1191 }
 0x1e9   :  { %v578_v43 = vmul.f32 %v1192_v39, %v576_v31 }
 0x1eb   :  { %v579_v48 = vsel %vm553_vm13, 0.0, %v578_v43 }
 0x1ec   :  { %v580_v49 = vmul.f32 %v579_v48, %v579_v48  ;;  %v1509_v41 = vmul.f32 %v579_v48, %v532_v17 }
 0x1ee   :  { %v581_v51 = vadd.f32 1.0, %v580_v49  ;;  %v1513_v56 = vsub.f32 %v1476_v42, %v1509_v41 }
 0x1f0   :  { %1193 = vrsqrt.f32 %v581_v51  ;;  %vm588_vm0 = vweird.f32 %v581_v51  ;;  %v620_v57 = vsub.f32 %v1513_v56, %v1517_v54 }
 0x1f2   :  { %v624_v25 = vmul.f32 %v620_v57, %v620_v57  ;;  %v623_v29 = vand.u32 2147483647, %v620_v57  ;;  %vm642_vm5 = vcmp.ge.f32.partialorder %v620_v57, 0.0 }
 0x1f3   :  { %v643_v43 = vsel %vm642_vm5, 1.0, %v1217_v30 }
 0x1f6   :  { %v1194_v52 = vpop.eup %1193 }
 0x1f7   :  { %v583_v46 = vmul.f32 %v1194_v52, %v581_v51  ;;  %vm589_vm15 = vweird.f32 %v1194_v52 }
 0x1f8   :  { %vm590_vm1 = vmor %vm588_vm0, %vm589_vm15 }
 0x1f9   :  { %v584_v53 = vmul.f32 %v1194_v52, %v583_v46 }
 0x1fb   :  { %v585_v45 = vmul.f32 0.5, %v584_v53 }
 0x1fd   :  { %v586_v35 = vsub.f32 1.5, %v585_v45 }
 0x1ff   :  { %v587_v55 = vmul.f32 %v1194_v52, %v586_v35 }
 0x201   :  { %v591_v50 = vsel %vm590_vm1, %v1194_v52, %v587_v55 }
 0x202   :  { %v592_v40 = vmul.f32 %v591_v50, %v579_v48  ;;  %v596_v44 = vmul.f32 %v591_v50, %v1493_v4  ;;  %v600_v16 = vmul.f32 0.0, %v591_v50  ;;  %v602_v7 = vmul.f32 %v591_v50, %v1456_v19 }
 0x203   :  { %v606_v42 = vmul.f32 %v591_v50, %v1497_v9  ;;  %v608_v8 = vmul.f32 %v591_v50, %v1460_v12  ;;  %v612_v11 = vmul.f32 %v591_v50, %v1501_v1  ;;  %v614_v15 = vmul.f32 %v591_v50, %v1465_v20 }
 0x204   :  { %v597_v61 = vmul.f32 0.0, %v592_v40  ;;  %v599_v0 = vmul.f32 %v592_v40, %v1493_v4  ;;  %v603_v14 = vmul.f32 %v592_v40, %v1497_v9  ;;  %v605_v13 = vmul.f32 %v592_v40, %v1456_v19 }
 0x205   :  { %v609_v63 = vmul.f32 %v592_v40, %v1501_v1  ;;  %v611_v17 = vmul.f32 %v592_v40, %v1460_v12  ;;  %v615_v58 = vmul.f32 %v592_v40, %v1506_v21  ;;  %v617_v62 = vmul.f32 %v592_v40, %v1465_v20 }
 0x206   :  { %v598_v22 = vsub.f32 %v596_v44, %v597_v61  ;;  %v1534_v59 = vadd.f32 %v600_v16, %v599_v0  ;;  %v1536_v10 = vsub.f32 %v602_v7, %v603_v14  ;;  %v1538_v23 = vadd.f32 %v606_v42, %v605_v13 }
 0x207   :  { %v1540_v4 = vsub.f32 %v608_v8, %v609_v63  ;;  %v1542_v9 = vadd.f32 %v612_v11, %v611_v17  ;;  %v1544_v19 = vsub.f32 %v614_v15, %v615_v58  ;;  %v618_v1 = vmul.f32 %v591_v50, %v1506_v21 }
 0x208   :  { %v625_v12 = vmul.f32 4.0, %v598_v22  ;;  %v621_v6 = vand.u32 2147483647, %v598_v22  ;;  %v644_v39 = vmul.f32 2.0, %v598_v22  ;;  %v1558_v16 = vadd.f32 %v1509_v41, %v1472_v47 }
 0x209   :  { %v1547_v24 = vadd.f32 %v618_v1, %v617_v62 }
 0x20a   :  { %v626_v20 = vmul.f32 %v625_v12, %v598_v22  ;;  %vm622_vm4 = vcmp.lt.f32.partialorder %v621_v6, 1e-37  ;;  %v645_v48 = vmul.f32 %v644_v39, %v643_v43 }
 0x20c   :  { %v627_v3 = vadd.f32 %v626_v20, %v624_v25 }
 0x20e   :  { %1195 = vrsqrt.f32 %v627_v3  ;;  %vm635_vm2 = vcmp.eq.f32.partialorder %v627_v3, inf  ;;  %v638_v36 = vand.u32 2147483648, %v627_v3  ;;  %vm637_vm3 = vcmp.eq.f32.partialorder %v627_v3, 0.0 }
 0x214   :  { %v1196_v26 = vpop.eup %1195 }
 0x215   :  { %v629_v27 = vmul.f32 %v1196_v26, %v627_v3 }
 0x217   :  { %v630_v28 = vmul.f32 %v1196_v26, %v629_v27 }
 0x219   :  { %v631_v60 = vmul.f32 0.5, %v630_v28 }
 0x21b   :  { %v632_v32 = vsub.f32 1.5, %v631_v60 }
 0x21d   :  { %v633_v33 = vmul.f32 %v1196_v26, %v632_v32 }
 0x21f   :  { %v634_v34 = vmul.f32 %v633_v33, %v627_v3 }
 0x221   :  { %v636_v37 = vsel %vm635_vm2, %v627_v3, %v634_v34 }
 0x222   :  { %v639_v21 = vsel %vm637_vm3, %v638_v36, %v636_v37 }
 0x223   :  { %v640_v38 = vadd.f32 %v639_v21, %v623_v29 }
 0x225   :  { %v641_v31 = vsel %vm622_vm4, 1.0, %v640_v38 }
 0x226   :  { %1197 = vrcp.f32 %v641_v31 }
 0x22c   :  { %v1198_v49 = vpop.eup %1197 }
 0x22d   :  { %v647_v51 = vmul.f32 %v1198_v49, %v645_v48 }
 0x22f   :  { %v648_v52 = vsel %vm622_vm4, 0.0, %v647_v51 }
 0x230   :  { %v649_v46 = vmul.f32 %v648_v52, %v648_v52  ;;  %v1550_v50 = vmul.f32 %v648_v52, %v598_v22 }
 0x232   :  { %v650_v53 = vadd.f32 1.0, %v649_v46  ;;  %v1554_v57 = vsub.f32 %v1517_v54, %v1550_v50 }
 0x234   :  { %1199 = vrsqrt.f32 %v650_v53  ;;  %vm657_vm7 = vweird.f32 %v650_v53  ;;  %v689_v8 = vsub.f32 %v1558_v16, %v1554_v57 }
 0x236   :  { %v693_v28 = vmul.f32 %v689_v8, %v689_v8  ;;  %v692_v31 = vand.u32 2147483647, %v689_v8  ;;  %vm711_vm12 = vcmp.ge.f32.partialorder %v689_v8, 0.0 }
 0x237   :  { %v712_v51 = vsel %vm711_vm12, 1.0, %v1217_v30 }
 0x23a   :  { %v1200_v45 = vpop.eup %1199 }
 0x23b   :  { %v652_v35 = vmul.f32 %v1200_v45, %v650_v53  ;;  %vm658_vm6 = vweird.f32 %v1200_v45 }
 0x23c   :  { %vm659_vm8 = vmor %vm657_vm7, %vm658_vm6 }
 0x23d   :  { %v653_v55 = vmul.f32 %v1200_v45, %v652_v35 }
 0x23f   :  { %v654_v40 = vmul.f32 0.5, %v653_v55 }
 0x241   :  { %v655_v44 = vsub.f32 1.5, %v654_v40 }
 0x243   :  { %v656_v7 = vmul.f32 %v1200_v45, %v655_v44 }
 0x245   :  { %v660_v42 = vsel %vm659_vm8, %v1200_v45, %v656_v7 }
 0x246   :  { %v661_v11 = vmul.f32 %v660_v42, %v648_v52  ;;  %v665_v15 = vmul.f32 %v660_v42, %v1534_v59  ;;  %v669_v61 = vmul.f32 0.0, %v660_v42  ;;  %v671_v0 = vmul.f32 %v660_v42, %v1495_v5 }
 0x247   :  { %v675_v54 = vmul.f32 %v660_v42, %v1536_v10  ;;  %v677_v14 = vmul.f32 %v660_v42, %v1499_v2  ;;  %v681_v47 = vmul.f32 %v660_v42, %v1540_v4  ;;  %v683_v41 = vmul.f32 %v660_v42, %v1503_v18 }
 0x248   :  { %v666_v13 = vmul.f32 0.0, %v661_v11  ;;  %v668_v63 = vmul.f32 %v661_v11, %v1534_v59  ;;  %v672_v17 = vmul.f32 %v661_v11, %v1536_v10  ;;  %v674_v58 = vmul.f32 %v661_v11, %v1495_v5 }
 0x249   :  { %v678_v62 = vmul.f32 %v661_v11, %v1540_v4  ;;  %v680_v22 = vmul.f32 %v661_v11, %v1499_v2  ;;  %v684_v1 = vmul.f32 %v661_v11, %v1544_v19  ;;  %v686_v12 = vmul.f32 %v661_v11, %v1503_v18 }
 0x24a   :  { %v667_v25 = vsub.f32 %v665_v15, %v666_v13  ;;  %v670_v20 = vadd.f32 %v669_v61, %v668_v63  ;;  %v1575_v3 = vsub.f32 %v671_v0, %v672_v17  ;;  %v1577_v26 = vadd.f32 %v675_v54, %v674_v58 }
 0x24b   :  { %v1579_v27 = vsub.f32 %v677_v14, %v678_v62  ;;  %v1581_v59 = vadd.f32 %v681_v47, %v680_v22  ;;  %v1583_v10 = vsub.f32 %v683_v41, %v684_v1  ;;  %v687_v5 = vmul.f32 %v660_v42, %v1544_v19 }
 0x24c   :  { %v694_v4 = vmul.f32 4.0, %v667_v25  ;;  %v690_v21 = vand.u32 2147483647, %v667_v25  ;;  %v713_v49 = vmul.f32 2.0, %v667_v25  ;;  %v664_v61 = vadd.f32 %v1550_v50, %v1513_v56 }
 0x24d   :  { %v1586_v2 = vadd.f32 %v687_v5, %v686_v12 }
 0x24e   :  { %v695_v60 = vmul.f32 %v694_v4, %v667_v25  ;;  %vm691_vm11 = vcmp.lt.f32.partialorder %v690_v21, 1e-37  ;;  %v714_v52 = vmul.f32 %v713_v49, %v712_v51 }
 0x250   :  { %v696_v18 = vadd.f32 %v695_v60, %v693_v28 }
 0x252   :  { %1201 = vrsqrt.f32 %v696_v18  ;;  %vm704_vm9 = vcmp.eq.f32.partialorder %v696_v18, inf  ;;  %v707_v38 = vand.u32 2147483648, %v696_v18  ;;  %vm706_vm10 = vcmp.eq.f32.partialorder %v696_v18, 0.0 }
 0x258   :  { %v1202_v32 = vpop.eup %1201 }
 0x259   :  { %v698_v33 = vmul.f32 %v1202_v32, %v696_v18 }
 0x25b   :  { %v699_v34 = vmul.f32 %v1202_v32, %v698_v33 }
 0x25d   :  { %v700_v6 = vmul.f32 0.5, %v699_v34 }
 0x25f   :  { %v701_v36 = vsub.f32 1.5, %v700_v6 }
 0x261   :  { %v702_v29 = vmul.f32 %v1202_v32, %v701_v36 }
 0x263   :  { %v703_v37 = vmul.f32 %v702_v29, %v696_v18 }
 0x265   :  { %v705_v39 = vsel %vm704_vm9, %v696_v18, %v703_v37 }
 0x266   :  { %v708_v19 = vsel %vm706_vm10, %v707_v38, %v705_v39 }
 0x267   :  { %v709_v43 = vadd.f32 %v708_v19, %v692_v31 }
 0x269   :  { %v710_v48 = vsel %vm691_vm11, 1.0, %v709_v43 }
 0x26a   :  { %1203 = vrcp.f32 %v710_v48 }
 0x270   :  { %v1204_v46 = vpop.eup %1203 }
 0x271   :  { %v716_v53 = vmul.f32 %v1204_v46, %v714_v52 }
 0x273   :  { %v717_v45 = vsel %vm691_vm11, 0.0, %v716_v53 }
 0x274   :  { %v718_v35 = vmul.f32 %v717_v45, %v717_v45  ;;  %v1589_v42 = vmul.f32 %v717_v45, %v667_v25 }
 0x276   :  { %v719_v55 = vadd.f32 1.0, %v718_v35  ;;  %v1593_v8 = vadd.f32 %v1589_v42, %v1558_v16 }
 0x278   :  { %1205 = vrsqrt.f32 %v719_v55  ;;  %vm726_vm14 = vweird.f32 %v719_v55  ;;  %v755_v14 = vsub.f32 %v1593_v8, %v664_v61 }
 0x27a   :  { %vm777_vm0 = vcmp.ge.f32.partialorder %v755_v14, 0.0  ;;  %v759_v32 = vmul.f32 %v755_v14, %v755_v14  ;;  %v758_v43 = vand.u32 2147483647, %v755_v14 }
 0x27e   :  { %v1206_v40 = vpop.eup %1205 }
 0x27f   :  { %v721_v44 = vmul.f32 %v1206_v40, %v719_v55  ;;  %vm727_vm13 = vweird.f32 %v1206_v40  ;;  %v732_v55 = vsub.f32 %v1554_v57, %v1589_v42 }
 0x280   :  { %vm728_vm15 = vmor %vm726_vm14, %vm727_vm13 }
 0x281   :  { %v722_v7 = vmul.f32 %v1206_v40, %v721_v44 }
 0x283   :  { %v723_v11 = vmul.f32 0.5, %v722_v7 }
 0x285   :  { %v724_v15 = vsub.f32 1.5, %v723_v11 }
 0x287   :  { %v725_v0 = vmul.f32 %v1206_v40, %v724_v15 }
 0x289   :  { %v729_v54 = vsel %vm728_vm15, %v1206_v40, %v725_v0 }
 0x28a   :  { %v730_v47 = vmul.f32 %v729_v54, %v717_v45  ;;  %v735_v41 = vmul.f32 %v729_v54, %v670_v20  ;;  %v737_v13 = vmul.f32 %v729_v54, %v1575_v3  ;;  %v741_v63 = vmul.f32 %v729_v54, %v1538_v23 }
 0x28b   :  { %v743_v17 = vmul.f32 %v729_v54, %v1579_v27  ;;  %v747_v16 = vmul.f32 %v729_v54, %v1542_v9  ;;  %v749_v58 = vmul.f32 %v729_v54, %v1583_v10  ;;  %v753_v56 = vmul.f32 %v729_v54, %v1547_v24 }
 0x28c   :  { %v734_v50 = vmul.f32 0.0, %v730_v47  ;;  %v738_v62 = vmul.f32 %v730_v47, %v1538_v23  ;;  %v740_v22 = vmul.f32 %v730_v47, %v1575_v3  ;;  %v744_v1 = vmul.f32 %v730_v47, %v1542_v9 }
 0x28d   :  { %v746_v12 = vmul.f32 %v730_v47, %v1579_v27  ;;  %v750_v25 = vmul.f32 %v730_v47, %v1547_v24  ;;  %v752_v20 = vmul.f32 %v730_v47, %v1583_v10  ;;  %v778_v24 = vsel %vm777_vm0, 1.0, %v1217_v30 }
 0x28e   :  { %v736_v5 = vadd.f32 %v735_v41, %v734_v50  ;;  %v1610_v4 = vsub.f32 %v737_v13, %v738_v62  ;;  %v1612_v28 = vadd.f32 %v741_v63, %v740_v22  ;;  %v1614_v60 = vsub.f32 %v743_v17, %v744_v1 }
 0x28f   :  { %v1616_v18 = vadd.f32 %v747_v16, %v746_v12  ;;  %v1618_v23 = vsub.f32 %v749_v58, %v750_v25  ;;  %v1620_v3 = vadd.f32 %v753_v56, %v752_v20 }
 0x290   :  { %v760_v9 = vmul.f32 4.0, %v736_v5  ;;  %v779_v27 = vmul.f32 2.0, %v736_v5  ;;  %v756_v39 = vand.u32 2147483647, %v736_v5 }
 0x292   :  { %v761_v10 = vmul.f32 %v760_v9, %v736_v5  ;;  %v780_v33 = vmul.f32 %v779_v27, %v778_v24  ;;  %vm757_vm3 = vcmp.lt.f32.partialorder %v756_v39, 1e-37 }
 0x294   :  { %v762_v34 = vadd.f32 %v761_v10, %v759_v32 }
 0x296   :  { %1207 = vrsqrt.f32 %v762_v34  ;;  %vm770_vm1 = vcmp.eq.f32.partialorder %v762_v34, inf  ;;  %v773_v19 = vand.u32 2147483648, %v762_v34  ;;  %vm772_vm2 = vcmp.eq.f32.partialorder %v762_v34, 0.0 }
 0x29c   :  { %v1208_v6 = vpop.eup %1207 }
 0x29d   :  { %v764_v36 = vmul.f32 %v1208_v6, %v762_v34 }
 0x29f   :  { %v765_v29 = vmul.f32 %v1208_v6, %v764_v36 }
 0x2a1   :  { %v766_v37 = vmul.f32 0.5, %v765_v29 }
 0x2a3   :  { %v767_v21 = vsub.f32 1.5, %v766_v37 }
 0x2a5   :  { %v768_v38 = vmul.f32 %v1208_v6, %v767_v21 }
 0x2a7   :  { %v769_v31 = vmul.f32 %v768_v38, %v762_v34 }
 0x2a9   :  { %v771_v48 = vsel %vm770_vm1, %v762_v34, %v769_v31 }
 0x2aa   :  { %v774_v49 = vsel %vm772_vm2, %v773_v19, %v771_v48 }
 0x2ab   :  { %v775_v30 = vadd.f32 %v774_v49, %v758_v43 }
 0x2ad   :  { %v776_v51 = vsel %vm757_vm3, 1.0, %v775_v30 }
 0x2ae   :  { %1209 = vrcp.f32 %v776_v51 }
 0x2b4   :  { %v1210_v52 = vpop.eup %1209 }
 0x2b5   :  { %v782_v46 = vmul.f32 %v1210_v52, %v780_v33 }
 0x2b7   :  { %v783_v53 = vsel %vm757_vm3, 0.0, %v782_v46 }
 0x2b8   :  { %v784_v45 = vmul.f32 %v783_v53, %v783_v53  ;;  %v797_v35 = vmul.f32 %v783_v53, %v736_v5 }
 0x2ba   :  { %v785_v40 = vadd.f32 1.0, %v784_v45  ;;  %v798_v44 = vsub.f32 %v664_v61, %v797_v35  ;;  %v799_v7 = vadd.f32 %v797_v35, %v1593_v8 }
 0x2bc   :  { %1211 = vrsqrt.f32 %v785_v40  ;;  %vm1626_vm4 = vcmp.gt.f32.partialorder %v732_v55, %v798_v44  ;;  %vm792_vm8 = vweird.f32 %v785_v40 }
 0x2bd   :  { %v819_v15 = vsel %vm1626_vm4, %v798_v44, %v732_v55  ;;  %v820_v0 = vsel %vm1626_vm4, %v732_v55, %v798_v44 }
 0x2be   :  { %vm1634_vm5 = vcmp.gt.f32.partialorder %v819_v15, %v799_v7 }
 0x2bf   :  { %v828_v57 = vsel %vm1634_vm5, %v819_v15, %v799_v7 }
 0x2c0   :  { %vm1640_vm6 = vcmp.gt.f32.partialorder %v820_v0, %v828_v57 }
 0x2c2   :  { %v1212_v8 = vpop.eup %1211 }
 0x2c3   :  { %v787_v61 = vmul.f32 %v1212_v8, %v785_v40  ;;  %vm793_vm7 = vweird.f32 %v1212_v8 }
 0x2c4   :  { %vm794_vm9 = vmor %vm792_vm8, %vm793_vm7 }
 0x2c5   :  { %v788_v14 = vmul.f32 %v1212_v8, %v787_v61 }
 0x2c7   :  { %v789_v47 = vmul.f32 0.5, %v788_v14 }
 0x2c9   :  { %v790_v41 = vsub.f32 1.5, %v789_v47 }
 0x2cb   :  { %v791_v13 = vmul.f32 %v1212_v8, %v790_v41 }
 0x2cd   :  { %v795_v63 = vsel %vm794_vm9, %v1212_v8, %v791_v13 }
 0x2ce   :  { %v796_v17 = vmul.f32 %v795_v63, %v783_v53  ;;  %v800_v16 = vmul.f32 %v795_v63, %v1577_v26  ;;  %v804_v58 = vmul.f32 %v795_v63, %v1612_v28  ;;  %v806_v56 = vmul.f32 %v795_v63, %v1581_v59 }
 0x2cf   :  { %v810_v50 = vmul.f32 %v795_v63, %v1616_v18  ;;  %v812_v62 = vmul.f32 %v795_v63, %v1586_v2  ;;  %v816_v22 = vmul.f32 %v795_v63, %v1620_v3 }
 0x2d0   :  { %v801_v1 = vmul.f32 %v796_v17, %v1612_v28  ;;  %v803_v12 = vmul.f32 %v796_v17, %v1577_v26  ;;  %v807_v25 = vmul.f32 %v796_v17, %v1616_v18  ;;  %v809_v20 = vmul.f32 %v796_v17, %v1581_v59 }
 0x2d1   :  { %v813_v5 = vmul.f32 %v796_v17, %v1620_v3  ;;  %v815_v9 = vmul.f32 %v796_v17, %v1586_v2 }
 0x2d2   :  { %v802_v27 = vsub.f32 %v800_v16, %v801_v1  ;;  %v805_v24 = vadd.f32 %v804_v58, %v803_v12  ;;  %v808_v32 = vsub.f32 %v806_v56, %v807_v25  ;;  %v811_v10 = vadd.f32 %v810_v50, %v809_v20  ;;  %v1695_v58 = vld [vmem:[%s1875_s0] sm:$0xff]  ;;  %v1700_v56 = vld [vmem:[%s1875_s0 + $0x8] sm:$0xff]  ;;  %v1705_v50 = vld [vmem:[%s1875_s0 + $0x10] sm:$0xff] }
 0x2d3   :  { %v814_v33 = vsub.f32 %v812_v62, %v813_v5  ;;  %v817_v34 = vadd.f32 %v816_v22, %v815_v9  ;;  %v1710_v62 = vld [vmem:[%s1875_s0 + $0x18] sm:$0xff]  ;;  %v1715_v22 = vld [vmem:[%s1875_s0 + $0x20] sm:$0xff]  ;;  %v1720_v1 = vld [vmem:[%s1875_s0 + $0x28] sm:$0xff] }
 0x2d4   :  { %v821_v28 = vsel %vm1626_vm4, %v802_v27, %v1610_v4  ;;  %v822_v26 = vsel %vm1626_vm4, %v808_v32, %v1614_v60  ;;  %v824_v59 = vsel %vm1626_vm4, %v1610_v4, %v802_v27  ;;  %v825_v2 = vsel %vm1626_vm4, %v1614_v60, %v808_v32  ;;  %v1725_v12 = vld [vmem:[%s1875_s0 + $0x30] sm:$0xff]  ;;  %v1730_v25 = vld [vmem:[%s1875_s0 + $0x38] sm:$0xff]  ;;  %v1735_v20 = vld [vmem:[%s1875_s0 + $0x40] sm:$0xff] }
 0x2d5   :  { %v823_v18 = vsel %vm1626_vm4, %v814_v33, %v1618_v23  ;;  %v829_v3 = vsel %vm1634_vm5, %v805_v24, %v821_v28  ;;  %v830_v6 = vsel %vm1634_vm5, %v811_v10, %v822_v26  ;;  %v826_v36 = vsel %vm1626_vm4, %v1618_v23, %v814_v33  ;;  %v1740_v5 = vld [vmem:[%s1875_s0 + $0x48] sm:$0xff]  ;;  %v1745_v27 = vld [vmem:[%s1875_s0 + $0x50] sm:$0xff] }
 0x2d6   :  { %v831_v4 = vsel %vm1634_vm5, %v817_v34, %v823_v18  ;;  %v839_v29 = vmul.f32 %v829_v3, %v829_v3  ;;  %v840_v37 = vmul.f32 %v830_v6, %v830_v6  ;;  %v832_v60 = vsel %vm1634_vm5, %v821_v28, %v805_v24  ;;  %v1750_v24 = vld [vmem:[%s1875_s0 + $0x58] sm:$0xff] }
 0x2d7   :  { %v842_v21 = vmul.f32 %v831_v4, %v831_v4  ;;  %v833_v38 = vsel %vm1634_vm5, %v822_v26, %v811_v10  ;;  %v834_v31 = vsel %vm1634_vm5, %v823_v18, %v817_v34  ;;  %v836_v39 = vsel %vm1640_vm6, %v824_v59, %v832_v60 }
 0x2d8   :  { %v841_v19 = vadd.f32 %v840_v37, %v839_v29  ;;  %v837_v23 = vsel %vm1640_vm6, %v825_v2, %v833_v38  ;;  %v838_v43 = vsel %vm1640_vm6, %v826_v36, %v834_v31  ;;  %v858_v48 = vmul.f32 %v836_v39, %v836_v39 }
 0x2d9   :  { %v859_v49 = vmul.f32 %v837_v23, %v837_v23  ;;  %v861_v52 = vmul.f32 %v838_v43, %v838_v43 }
 0x2da   :  { %v843_v30 = vadd.f32 %v842_v21, %v841_v19 }
 0x2db   :  { %v860_v51 = vadd.f32 %v859_v49, %v858_v48 }
 0x2dc   :  { %v844_v46 = vadd.f32 1e-12, %v843_v30 }
 0x2dd   :  { %v862_v53 = vadd.f32 %v861_v52, %v860_v51 }
 0x2de   :  { %1213 = vrsqrt.f32 %v844_v46  ;;  %vm851_vm11 = vweird.f32 %v844_v46 }
 0x2df   :  { %v863_v45 = vadd.f32 1e-12, %v862_v53 }
 0x2e1   :  { %1215 = vrsqrt.f32 %v863_v45  ;;  %vm870_vm14 = vweird.f32 %v863_v45 }
 0x2e4   :  { %v1214_v35 = vpop.eup %1213 }
 0x2e5   :  { %v846_v55 = vmul.f32 %v1214_v35, %v844_v46  ;;  %vm852_vm10 = vweird.f32 %v1214_v35 }
 0x2e6   :  { %vm853_vm12 = vmor %vm851_vm11, %vm852_vm10 }
 0x2e7   :  { %v1216_v40 = vpop.eup %1215  ;;  %v847_v44 = vmul.f32 %v1214_v35, %v846_v55 }
 0x2e8   :  { %v865_v7 = vmul.f32 %v1216_v40, %v863_v45  ;;  %vm871_vm13 = vweird.f32 %v1216_v40 }
 0x2e9   :  { %v848_v11 = vmul.f32 0.5, %v847_v44  ;;  %vm872_vm15 = vmor %vm870_vm14, %vm871_vm13 }
 0x2ea   :  { %v866_v15 = vmul.f32 %v1216_v40, %v865_v7 }
 0x2eb   :  { %v849_v0 = vsub.f32 1.5, %v848_v11 }
 0x2ec   :  { %v867_v54 = vmul.f32 0.5, %v866_v15 }
 0x2ed   :  { %v850_v57 = vmul.f32 %v1214_v35, %v849_v0 }
 0x2ee   :  { %v868_v42 = vsub.f32 1.5, %v867_v54 }
 0x2ef   :  { %v854_v8 = vsel %vm853_vm12, %v1214_v35, %v850_v57 }
 0x2f0   :  { %v855_v61 = vmul.f32 %v854_v8, %v829_v3  ;;  %v856_v14 = vmul.f32 %v854_v8, %v830_v6  ;;  %v857_v47 = vmul.f32 %v854_v8, %v831_v4  ;;  %v869_v41 = vmul.f32 %v1216_v40, %v868_v42 }
 0x2f2   :  { %877 = vst [vmem:[#allocation2 + $0x8] sm:$0x1] %v855_v61  ;;  %v873_v13 = vsel %vm872_vm15, %v1216_v40, %v869_v41  ;;  %v1218_v40 = vmov 0.0  }
 0x2f3   :  { %879 = vst [vmem:[#allocation2 + $0x28] sm:$0x1] %v856_v14  ;;  %v874_v63 = vmul.f32 %v873_v13, %v836_v39  ;;  %v875_v17 = vmul.f32 %v873_v13, %v837_v23  ;;  %v876_v16 = vmul.f32 %v873_v13, %v838_v43 }
 0x2f4   :  { %881 = vst [vmem:[#allocation2 + $0x10] sm:$0x1] %v857_v47 }
 0x2f5   :  { %878 = vst [vmem:[#allocation2 + $0x48] sm:$0x1] %v874_v63 }
 0x2f6   :  { %880 = vst [vmem:[#allocation2 + $0x50] sm:$0x1] %v875_v17 }
 0x2f7   :  { %882 = vst [vmem:[#allocation2 + $0x38] sm:$0x1] %v876_v16 }
 0x2f9   :  { %v1143_v9 = vld [vmem:[#allocation2 + $0x8] ss:$0 sm:$0xff] }
 0x2fa   :  { %v1144_v32 = vld [vmem:[#allocation2 + $0x28] ss:$0 sm:$0xff]  ;;  %v899_v10 = vmul.f32 %v1143_v9, %v1695_v58  ;;  %v900_v33 = vmul.f32 %v1143_v9, %v1700_v56  ;;  %v901_v34 = vmul.f32 %v1143_v9, %v1705_v50  ;;  %v902_v28 = vmul.f32 %v1143_v9, %v1710_v62 }
 0x2fb   :  { %v1145_v26 = vld [vmem:[#allocation2 + $0x10] ss:$0 sm:$0xff]  ;;  %v904_v59 = vmul.f32 %v1144_v32, %v1715_v22  ;;  %v905_v2 = vmul.f32 %v1144_v32, %v1720_v1  ;;  %v906_v18 = vmul.f32 %v1144_v32, %v1725_v12  ;;  %v907_v3 = vmul.f32 %v1144_v32, %v1730_v25 }
 0x2fc   :  { %v1146_v6 = vld [vmem:[#allocation2 + $0x48] ss:$0 sm:$0xff]  ;;  %v913_v36 = vmul.f32 %v1145_v26, %v1735_v20  ;;  %v914_v4 = vmul.f32 %v1145_v26, %v1740_v5  ;;  %v915_v29 = vmul.f32 %v1145_v26, %v1745_v27  ;;  %v916_v37 = vmul.f32 %v1145_v26, %v1750_v24 }
 0x2fd   :  { %v1147_v60 = vld [vmem:[#allocation2 + $0x50] ss:$0 sm:$0xff]  ;;  %v908_v21 = vadd.f32 %v904_v59, %v899_v10  ;;  %v909_v38 = vadd.f32 %v905_v2, %v900_v33  ;;  %v910_v31 = vadd.f32 %v906_v18, %v901_v34  ;;  %v911_v39 = vadd.f32 %v907_v3, %v902_v28 }
 0x2fe   :  { %v951_v19 = vmul.f32 %v1146_v6, %v1695_v58  ;;  %v952_v23 = vmul.f32 %v1146_v6, %v1700_v56  ;;  %v953_v43 = vmul.f32 %v1146_v6, %v1705_v50  ;;  %v954_v48 = vmul.f32 %v1146_v6, %v1710_v62  ;;  %v1148_v55 = vld [vmem:[#allocation2 + $0x38] ss:$0 sm:$0xff] }
 0x2ff   :  { %v917_v49 = vadd.f32 %v913_v36, %v908_v21  ;;  %v918_v30 = vadd.f32 %v914_v4, %v909_v38  ;;  %v919_v51 = vadd.f32 %v915_v29, %v910_v31  ;;  %v920_v52 = vadd.f32 %v916_v37, %v911_v39  ;;  %v895_v38 = vld [vmem:[#allocation2 + $0x8] sm:$0x1]  ;;  %v897_v39 = vld [vmem:[#allocation2 + $0x10] sm:$0x1] }
 0x300   :  { %v956_v46 = vmul.f32 %v1147_v60, %v1715_v22  ;;  %v957_v53 = vmul.f32 %v1147_v60, %v1720_v1  ;;  %v958_v45 = vmul.f32 %v1147_v60, %v1725_v12  ;;  %v959_v35 = vmul.f32 %v1147_v60, %v1730_v25  ;;  %v896_v31 = vld [vmem:[#allocation2 + $0x28] sm:$0x1] }
 0x301   :  { %vm921_vm0 = vcmp.gt.f32.partialorder %v917_v49, 0.0  ;;  %vm922_vm1 = vcmp.gt.f32.partialorder %v918_v30, 0.0  ;;  %vm923_vm2 = vcmp.gt.f32.partialorder %v919_v51, 0.0  ;;  %vm924_vm3 = vcmp.gt.f32.partialorder %v920_v52, 0.0 }
 0x302   :  { %v1124_v44 = vsel %vm921_vm0, 1.0, %v1218_v40  ;;  %v1125_v7 = vsel %vm922_vm1, 1.0, %v1218_v40  ;;  %v1126_v11 = vsel %vm923_vm2, 1.0, %v1218_v40  ;;  %v960_v0 = vadd.f32 %v956_v46, %v951_v19 }
 0x303   :  { %v933_v15 = vadd.f32 %v1125_v7, %v1124_v44  ;;  %v961_v54 = vadd.f32 %v957_v53, %v952_v23  ;;  %v962_v57 = vadd.f32 %v958_v45, %v953_v43  ;;  %v963_v42 = vadd.f32 %v959_v35, %v954_v48  ;;  %v947_v44 = vld [vmem:[#allocation2 + $0x48] sm:$0x1] }
 0x304   :  { %v965_v8 = vmul.f32 %v1148_v55, %v1735_v20  ;;  %v966_v61 = vmul.f32 %v1148_v55, %v1740_v5  ;;  %v967_v14 = vmul.f32 %v1148_v55, %v1745_v27  ;;  %v968_v41 = vmul.f32 %v1148_v55, %v1750_v24 }
 0x305   :  { %v934_v47 = vadd.f32 %v1126_v11, %v933_v15  ;;  %v1127_v13 = vsel %vm924_vm3, 1.0, %v1218_v40  ;;  %v1219_v19 = vmov 1.0  }
 0x306   :  { %v969_v63 = vadd.f32 %v965_v8, %v960_v0  ;;  %v970_v17 = vadd.f32 %v966_v61, %v961_v54  ;;  %v971_v16 = vadd.f32 %v967_v14, %v962_v57  ;;  %v972_v32 = vadd.f32 %v968_v41, %v963_v42  ;;  %v948_v0 = vld [vmem:[#allocation2 + $0x50] sm:$0x1]  ;;  %v949_v54 = vld [vmem:[#allocation2 + $0x38] sm:$0x1] }
 0x307   :  { %v935_v9 = vadd.f32 %v1127_v13, %v934_v47 }
 0x308   :  { %vm973_vm4 = vcmp.gt.f32.partialorder %v969_v63, 0.0  ;;  %vm974_vm5 = vcmp.gt.f32.partialorder %v970_v17, 0.0  ;;  %vm975_vm6 = vcmp.gt.f32.partialorder %v971_v16, 0.0  ;;  %vm976_vm7 = vcmp.gt.f32.partialorder %v972_v32, 0.0 }
 0x309   :  { %v936_v10 = vrot.slane %v935_v9, 4  ;;  %v1128_v33 = vsel %vm973_vm4, 1.0, %v1218_v40  ;;  %v1129_v34 = vsel %vm974_vm5, 1.0, %v1218_v40  ;;  %v1130_v59 = vsel %vm975_vm6, 1.0, %v1218_v40 }
 0x30a   :  { %v985_v28 = vadd.f32 %v1129_v34, %v1128_v33  ;;  %v1131_v3 = vsel %vm976_vm7, 1.0, %v1218_v40 }
 0x30b   :  { %v937_v26 = vadd.f32 %v936_v10, %v935_v9 }
 0x30c   :  { %v986_v2 = vadd.f32 %v1130_v59, %v985_v28 }
 0x30d   :  { %v938_v18 = vrot.slane %v937_v26, 2 }
 0x30e   :  { %v987_v6 = vadd.f32 %v1131_v3, %v986_v2 }
 0x30f   :  { %v939_v36 = vadd.f32 %v938_v18, %v937_v26 }
 0x310   :  { %v988_v4 = vrot.slane %v987_v6, 4 }
 0x311   :  { %v940_v29 = vrot.slane %v939_v36, 1 }
 0x312   :  { %v989_v37 = vadd.f32 %v988_v4, %v987_v6 }
 0x313   :  { %v941_v60 = vadd.f32 %v940_v29, %v939_v36 }
 0x314   :  { %v990_v21 = vrot.slane %v989_v37, 2 }
 0x315   :  { %vm942_vm8 = vcmp.lt.f32.partialorder %v941_v60, 16.0 }
 0x316   :  { %v943_v23 = vsel %vm942_vm8, -1.0, %v1219_v19  ;;  %v991_v43 = vadd.f32 %v990_v21, %v989_v37 }
 0x317   :  { %v944_v48 = vmul.f32 %v943_v23, %v895_v38  ;;  %v945_v49 = vmul.f32 %v943_v23, %v896_v31  ;;  %v946_v30 = vmul.f32 %v943_v23, %v897_v39 }
 0x318   :  { %v992_v51 = vrot.slane %v991_v43, 1 }
 0x319   :  { %1008 = vst [vmem:[%s1876_s2] sm:$0x1] %v944_v48  ;;  %v1017_v52 = vperm.slane %v944_v48, 0  ;;  %v1022_v46 = vperm.slane %v945_v49, 0  ;;  %v1031_v53 = vperm.slane %v946_v30, 0 }
 0x31a   :  { %1011 = vst [vmem:[%s1876_s2 + $0x3] sm:$0x1] %v945_v49  ;;  %v993_v45 = vadd.f32 %v992_v51, %v991_v43 }
 0x31b   :  { %1014 = vst [vmem:[%s1876_s2 + $0x6] sm:$0x1] %v946_v30  ;;  %v1018_v35 = vmul.f32 %v1017_v52, %v1695_v58  ;;  %v1023_v55 = vmul.f32 %v1715_v22, %v1022_v46  ;;  %v1019_v40 = vmul.f32 %v1017_v52, %v1700_v56  ;;  %v1032_v7 = vmul.f32 %v1735_v20, %v1031_v53 }
 0x31c   :  { %vm994_vm9 = vcmp.lt.f32.partialorder %v993_v45, 16.0  ;;  %v1024_v11 = vmul.f32 %v1720_v1, %v1022_v46  ;;  %v1020_v15 = vmul.f32 %v1017_v52, %v1705_v50  ;;  %v1033_v8 = vmul.f32 %v1740_v5, %v1031_v53 }
 0x31d   :  { %v995_v57 = vsel %vm994_vm9, -1.0, %v1219_v19  ;;  %v1027_v42 = vadd.f32 %v1023_v55, %v1018_v35  ;;  %v1025_v61 = vmul.f32 %v1725_v12, %v1022_v46  ;;  %v1021_v16 = vmul.f32 %v1017_v52, %v1710_v62 }
 0x31e   :  { %v996_v14 = vmul.f32 %v995_v57, %v947_v44  ;;  %v997_v47 = vmul.f32 %v995_v57, %v948_v0  ;;  %v998_v41 = vmul.f32 %v995_v57, %v949_v54  ;;  %v1028_v13 = vadd.f32 %v1024_v11, %v1019_v40 }
 0x31f   :  { %v1036_v63 = vadd.f32 %v1032_v7, %v1027_v42  ;;  %v1029_v17 = vadd.f32 %v1025_v61, %v1020_v15  ;;  %v1026_v9 = vmul.f32 %v1730_v25, %v1022_v46  ;;  %v1034_v2 = vmul.f32 %v1745_v27, %v1031_v53 }
 0x320   :  { %1010 = vst [vmem:[%s1876_s2 + $0x2] sm:$0x1] %v996_v14  ;;  %v999_v32 = vmul.f32 %v998_v41, %v945_v49  ;;  %v1000_v10 = vmul.f32 %v997_v47, %v946_v30  ;;  %v1002_v33 = vmul.f32 %v996_v14, %v946_v30  ;;  %v1003_v34 = vmul.f32 %v998_v41, %v944_v48 }
 0x321   :  { %1013 = vst [vmem:[%s1876_s2 + $0x5] sm:$0x1] %v997_v47  ;;  %v1005_v28 = vmul.f32 %v997_v47, %v944_v48  ;;  %v1006_v26 = vmul.f32 %v996_v14, %v945_v49  ;;  %v1037_v59 = vadd.f32 %v1033_v8, %v1028_v13  ;;  %v1030_v6 = vadd.f32 %v1026_v9, %v1021_v16 }
 0x322   :  { %1016 = vst [vmem:[%s1876_s2 + $0x8] sm:$0x1] %v998_v41  ;;  %v1001_v18 = vsub.f32 %v999_v32, %v1000_v10  ;;  %v1004_v3 = vsub.f32 %v1002_v33, %v1003_v34  ;;  %v1035_v36 = vmul.f32 %v1750_v24, %v1031_v53  ;;  %v1072_v29 = vperm.slane %v996_v14, 0 }
 0x323   :  { %v1007_v4 = vsub.f32 %v1005_v28, %v1006_v26  ;;  %1040 = vst [vmem:[%s1877_s1] sm:$0xff] %v1036_v63  ;;  %v1077_v37 = vperm.slane %v997_v47, 0  ;;  %v1086_v60 = vperm.slane %v998_v41, 0  ;;  %v1038_v31 = vadd.f32 %v1034_v2, %v1029_v17 }
 0x324   :  { %1009 = vst [vmem:[%s1876_s2 + $0x1] sm:$0x1] %v1001_v18  ;;  %v1044_v21 = vperm.slane %v1001_v18, 0  ;;  %v1049_v38 = vperm.slane %v1004_v3, 0  ;;  %v1039_v19 = vadd.f32 %v1035_v36, %v1030_v6  ;;  %v1073_v23 = vmul.f32 %v1072_v29, %v1695_v58 }
 0x325   :  { %1012 = vst [vmem:[%s1876_s2 + $0x4] sm:$0x1] %v1004_v3  ;;  %v1058_v39 = vperm.slane %v1007_v4, 0  ;;  %v1078_v43 = vmul.f32 %v1715_v22, %v1077_v37  ;;  %v1087_v48 = vmul.f32 %v1735_v20, %v1086_v60  ;;  %v1074_v49 = vmul.f32 %v1072_v29, %v1700_v56 }
 0x326   :  { %1015 = vst [vmem:[%s1876_s2 + $0x7] sm:$0x1] %v1007_v4  ;;  %v1079_v30 = vmul.f32 %v1720_v1, %v1077_v37  ;;  %v1075_v51 = vmul.f32 %v1072_v29, %v1705_v50  ;;  %v1088_v46 = vmul.f32 %v1740_v5, %v1086_v60  ;;  %v1080_v53 = vmul.f32 %v1725_v12, %v1077_v37 }
 0x327   :  { %1041 = vst [vmem:[%s1877_s1 + $0x8] sm:$0xff] %v1037_v59  ;;  %v1082_v52 = vadd.f32 %v1078_v43, %v1073_v23  ;;  %v1076_v45 = vmul.f32 %v1072_v29, %v1710_v62  ;;  %v1089_v55 = vmul.f32 %v1745_v27, %v1086_v60  ;;  %v1081_v40 = vmul.f32 %v1730_v25, %v1077_v37 }
 0x328   :  { %1042 = vst [vmem:[%s1877_s1 + $0x10] sm:$0xff] %v1038_v31  ;;  %v1083_v35 = vadd.f32 %v1079_v30, %v1074_v49  ;;  %v1045_v44 = vmul.f32 %v1044_v21, %v1695_v58  ;;  %v1084_v11 = vadd.f32 %v1080_v53, %v1075_v51  ;;  %v1090_v15 = vmul.f32 %v1750_v24, %v1086_v60 }
 0x329   :  { %1043 = vst [vmem:[%s1877_s1 + $0x18] sm:$0xff] %v1039_v19  ;;  %v1091_v7 = vadd.f32 %v1087_v48, %v1082_v52  ;;  %v1050_v0 = vmul.f32 %v1715_v22, %v1049_v38  ;;  %v1085_v57 = vadd.f32 %v1081_v40, %v1076_v45  ;;  %v1046_v42 = vmul.f32 %v1044_v21, %v1700_v56 }
 0x32a   :  { %v1092_v54 = vadd.f32 %v1088_v46, %v1083_v35  ;;  %v1051_v8 = vmul.f32 %v1720_v1, %v1049_v38  ;;  %v1093_v58 = vadd.f32 %v1089_v55, %v1084_v11  ;;  %v1059_v14 = vmul.f32 %v1735_v20, %v1058_v39 }
 0x32b   :  { %1136 = vst [vmem:[%s1877_s1 + $0x40] sm:$0xff] %v1091_v7  ;;  %v1054_v61 = vadd.f32 %v1050_v0, %v1045_v44  ;;  %v1047_v47 = vmul.f32 %v1044_v21, %v1705_v50  ;;  %v1094_v22 = vadd.f32 %v1090_v15, %v1085_v57  ;;  %v1060_v56 = vmul.f32 %v1740_v5, %v1058_v39 }
 0x32c   :  { %1137 = vst [vmem:[%s1877_s1 + $0x48] sm:$0xff] %v1092_v54  ;;  %v1055_v41 = vadd.f32 %v1051_v8, %v1046_v42  ;;  %v1052_v1 = vmul.f32 %v1725_v12, %v1049_v38  ;;  %v1048_v63 = vmul.f32 %v1044_v21, %v1710_v62  ;;  %v1053_v20 = vmul.f32 %v1730_v25, %v1049_v38 }
 0x32d   :  { %1138 = vst [vmem:[%s1877_s1 + $0x50] sm:$0xff] %v1093_v58  ;;  %v1063_v13 = vadd.f32 %v1059_v14, %v1054_v61  ;;  %v1061_v16 = vmul.f32 %v1745_v27, %v1058_v39  ;;  %v1062_v5 = vmul.f32 %v1750_v24, %v1058_v39 }
 0x32e   :  { %1139 = vst [vmem:[%s1877_s1 + $0x58] sm:$0xff] %v1094_v22  ;;  %v1064_v50 = vadd.f32 %v1060_v56, %v1055_v41  ;;  %v1056_v17 = vadd.f32 %v1052_v1, %v1047_v47  ;;  %v1057_v12 = vadd.f32 %v1053_v20, %v1048_v63 }
 0x32f   :  { %1132 = vst [vmem:[%s1877_s1 + $0x20] sm:$0xff] %v1063_v13 }
 0x330   :  { %1133 = vst [vmem:[%s1877_s1 + $0x28] sm:$0xff] %v1064_v50  ;;  %v1065_v62 = vadd.f32 %v1061_v16, %v1056_v17  ;;  %v1066_v25 = vadd.f32 %v1062_v5, %v1057_v12 }
 0x332   :  { %1134 = vst [vmem:[%s1877_s1 + $0x30] sm:$0xff] %v1065_v62 }
 0x333   :  { %1135 = vst [vmem:[%s1877_s1 + $0x38] sm:$0xff] %v1066_v25 }

</bundles_post_ra>
